<compile_context>
chip_gen: v7x
topology: tpu7x:2x2x1
jax: 0.10.0
libtpu: 0.0.40
codegen_flags: <defaults>
</compile_context>

<pallas_src>
import functools

import jax
import jax.numpy as jnp
import numpy as np
from jax import lax
from jax.experimental import pallas as pl
from jax.experimental.pallas import tpu as pltpu

# ----------------------------------------------------------------------------
# Small deterministic config (mirrors NER.__init__ arguments)
# ----------------------------------------------------------------------------
NUM_TAGS = 8
CHAR_VOCAB = 50
CHAR_EMBED = 16
CHANNEL = 32
KSIZE = 3
NUM_BLOCK_LAYER = 3
NUM_BLOCK = 2
SEG_VOCAB = 5
SEG_EMBED = 8
BIGRAM_VOCAB = 60
BIGRAM_EMBED = 8
NUM_BIGRAM_FEATS = 2  # x[:, :, 1:] has 2 columns -> input_size += 2*bigram_embed

INPUT_SIZE = CHAR_EMBED + BIGRAM_EMBED * NUM_BIGRAM_FEATS + SEG_EMBED  # 40

# DilatedConvBlock dilations: [1] + [2**(l+1) for l in range(L-2)] + [1]
BLOCK_DILATIONS = tuple([1] + [2 ** (l + 1) for l in range(NUM_BLOCK_LAYER - 2)]
                        + [1])
MAX_DIL = max((1,) + BLOCK_DILATIONS)
SCRATCH_PAD = 8  # >= MAX_DIL; 8 keeps the interior scratch store sublane-aligned
assert SCRATCH_PAD >= MAX_DIL

TOTAL_VOCAB = CHAR_VOCAB + NUM_BIGRAM_FEATS * BIGRAM_VOCAB + SEG_VOCAB  # 175

B, S = 2, 16  # batch, sequence length


# ----------------------------------------------------------------------------
# Pallas kernel: embeddings + 7 dilated convs + linear head + argmax decode
# ----------------------------------------------------------------------------
def ner_kernel(ids_ref, seg_ref, emb_tab_ref, w0_ref, b0_ref, wb_ref, bb_ref,
               wl_ref, bl_ref, logits_ref, pred_ref, xpad_ref, *,
               batch, seq, ksize, block_dilations, num_block, num_tags,
               input_size, channel, pad, char_vocab, bigram_vocab, total_vocab):
  r = batch * seq
  half = (ksize - 1) // 2

  # Padding rows of the activation scratch provide the per-sequence zero
  # padding of the "same" convs: zero once, never write them again.
  xpad_ref[...] = jnp.zeros_like(xpad_ref)

  # ---- fused embedding lookup: one one-hot matmul over a combined table ----
  # Table rows: [char | bigram(copy, feat 1) | bigram(copy, feat 2) | seg],
  # each copy placed in its own column range, so a single dot yields the
  # concatenated (char ++ bigram1 ++ bigram2 ++ seg) feature row directly.
  ids = ids_ref[...]                                   # (R, 3) int32
  seg_ids = seg_ref[...]                               # (R, 1) int32
  vocab_iota = lax.broadcasted_iota(jnp.int32, (r, total_vocab), 1)
  onehot = ((ids[:, 0:1] == vocab_iota)
            | (ids[:, 1:2] + char_vocab == vocab_iota)
            | (ids[:, 2:3] + char_vocab + bigram_vocab == vocab_iota)
            | (seg_ids + char_vocab + 2 * bigram_vocab == vocab_iota))
  x = jnp.dot(onehot.astype(jnp.float32), emb_tab_ref[...],
              preferred_element_type=jnp.float32)      # (R, input_size)
  # input dropout: identity in eval mode

  # Per-row position inside its sequence; used to mask rows a shifted read
  # would otherwise pull across the batch boundary.
  local = jnp.concatenate(
      [lax.broadcasted_iota(jnp.int32, (seq, 1), 0)] * batch, axis=0)  # (R, 1)

  def conv(xin, cin, w_at, bias, dil):
    """nn.Conv1d(kernel=3, padding=dil, dilation=dil) as 3 shifted MXU dots."""
    # Stash this layer's input in the zero-padded scratch; the +/-dil taps are
    # read back as static shifted views (no concat/copy passes).
    xpad_ref[pl.ds(pad, r), pl.ds(0, cin)] = xin
    acc = jnp.dot(xin, w_at(half), preferred_element_type=jnp.float32) + bias
    for k in range(ksize):
      s = (k - half) * dil
      if s == 0:
        continue
      shifted = xpad_ref[pl.ds(pad + s, r), pl.ds(0, cin)]
      keep = (local >= -s) if s < 0 else (local < seq - s)
      acc = acc + jnp.dot(jnp.where(keep, shifted, 0.0), w_at(k),
                          preferred_element_type=jnp.float32)
    return acc

  # conv0 (dilation 1), then num_block applications of the weight-shared block.
  x = conv(x, input_size, lambda k: w0_ref[k], b0_ref[...], 1)
  for _ in range(num_block):
    for li, dil in enumerate(block_dilations):
      x = conv(x, channel, lambda k, li=li: wb_ref[li, k], bb_ref[li], dil)
    # hidden dropout: identity in eval mode

  # linear head
  logits = (jnp.dot(x, wl_ref[...], preferred_element_type=jnp.float32)
            + bl_ref[...])
  logits_ref[...] = logits                             # (R, T)

  # decode: argmax(softmax(logits)) == argmax(logits); first index on ties.
  lmax = jnp.max(logits, axis=-1, keepdims=True)
  tag_idx = lax.broadcasted_iota(jnp.int32, logits.shape, 1)
  pred = jnp.min(jnp.where(logits >= lmax, tag_idx, num_tags),
                 axis=-1, keepdims=True)
  pred_ref[...] = pred                                 # (R, 1) int32


# ----------------------------------------------------------------------------
# One-time parameter re-layout (hoisted out of the per-call path)
# ----------------------------------------------------------------------------
def prepare_params(params):
  tab = jnp.zeros((TOTAL_VOCAB, INPUT_SIZE), jnp.float32)
  tab = tab.at[:CHAR_VOCAB, :CHAR_EMBED].set(params["char_emb"])
  o_r, o_c = CHAR_VOCAB, CHAR_EMBED
  tab = tab.at[o_r:o_r + BIGRAM_VOCAB,
               o_c:o_c + BIGRAM_EMBED].set(params["bigram_emb"])
  o_r, o_c = o_r + BIGRAM_VOCAB, o_c + BIGRAM_EMBED
  tab = tab.at[o_r:o_r + BIGRAM_VOCAB,
               o_c:o_c + BIGRAM_EMBED].set(params["bigram_emb"])
  o_r, o_c = o_r + BIGRAM_VOCAB, o_c + BIGRAM_EMBED
  tab = tab.at[o_r:o_r + SEG_VOCAB, o_c:o_c + SEG_EMBED].set(params["seg_emb"])
  return {
      "emb_tab": tab,                                        # (175, 40)
      "w0": jnp.transpose(params["conv0_w"], (2, 1, 0)),     # (K, Cin, C)
      "b0": params["conv0_b"][None, :],                      # (1, C)
      "wb": jnp.transpose(params["block_w"], (0, 3, 2, 1)),  # (L, K, C, C)
      "bb": params["block_b"][:, None, :],                   # (L, 1, C)
      "wl": params["lin_w"].T,                               # (C, T)
      "bl": params["lin_b"][None, :],                        # (1, T)
  }


# ----------------------------------------------------------------------------
# Forward wrapper (single pallas_call, grid=(1,))
# ----------------------------------------------------------------------------
@jax.jit
def ner_forward(prep, x, seg_tags, masks):
  del masks  # only used by the CRF path (use_crf=False)
  b, s, _ = x.shape
  r, t = b * s, NUM_TAGS
  ids = x.reshape(r, x.shape[2]).astype(jnp.int32)   # (R, 3): char, bg0, bg1
  seg = seg_tags.reshape(r, 1).astype(jnp.int32)     # (R, 1)

  kern = functools.partial(
      ner_kernel, batch=b, seq=s, ksize=KSIZE,
      block_dilations=BLOCK_DILATIONS, num_block=NUM_BLOCK, num_tags=t,
      input_size=INPUT_SIZE, channel=CHANNEL, pad=SCRATCH_PAD,
      char_vocab=CHAR_VOCAB, bigram_vocab=BIGRAM_VOCAB,
      total_vocab=TOTAL_VOCAB)

  def full_spec(arr):
    n = arr.ndim
    return pl.BlockSpec(arr.shape, lambda i, n=n: (0,) * n)

  logits_flat, pred_flat = pl.pallas_call(
      kern,
      out_shape=(jax.ShapeDtypeStruct((r, t), jnp.float32),
                 jax.ShapeDtypeStruct((r, 1), jnp.int32)),
      grid_spec=pltpu.PrefetchScalarGridSpec(
          num_scalar_prefetch=0,
          grid=(1,),  # whole problem (B*S = 32 rows) in a single step
          in_specs=[full_spec(ids), full_spec(seg), full_spec(prep["emb_tab"]),
                    full_spec(prep["w0"]), full_spec(prep["b0"]),
                    full_spec(prep["wb"]), full_spec(prep["bb"]),
                    full_spec(prep["wl"]), full_spec(prep["bl"])],
          out_specs=(pl.BlockSpec((r, t), lambda i: (0, 0)),
                     pl.BlockSpec((r, 1), lambda i: (0, 0))),
          scratch_shapes=[pltpu.VMEM((r + 2 * SCRATCH_PAD, INPUT_SIZE),
                                     jnp.float32)]),
      compiler_params=pltpu.CompilerParams(
          dimension_semantics=("arbitrary",)),
  )(ids, seg, prep["emb_tab"], prep["w0"], prep["b0"], prep["wb"],
    prep["bb"], prep["wl"], prep["bl"])

  return logits_flat.reshape(b, s, t), pred_flat.reshape(b, s)


# ----------------------------------------------------------------------------
# Deterministic parameter init + pure-JAX reference for verification
# ----------------------------------------------------------------------------
def init_params(key):
  keys = jax.random.split(key, 9)

  def nrm(kk, shape, scale=0.1):
    return scale * jax.random.normal(kk, shape, dtype=jnp.float32)

  def emb(kk, shape):
    # bf16-representable values => the in-kernel one-hot-matmul "gather" is
    # bit-identical to jnp.take regardless of the MXU's f32 decomposition.
    return nrm(kk, shape).astype(jnp.bfloat16).astype(jnp.float32)

  return {
      "char_emb": emb(keys[0], (CHAR_VOCAB, CHAR_EMBED)),
      "bigram_emb": emb(keys[1], (BIGRAM_VOCAB, BIGRAM_EMBED)),
      "seg_emb": emb(keys[2], (SEG_VOCAB, SEG_EMBED)),
      "conv0_w": nrm(keys[3], (CHANNEL, INPUT_SIZE, KSIZE)),
      "conv0_b": nrm(keys[4], (CHANNEL,)),
      "block_w": nrm(keys[5], (NUM_BLOCK_LAYER, CHANNEL, CHANNEL, KSIZE)),
      "block_b": nrm(keys[6], (NUM_BLOCK_LAYER, CHANNEL)),
      "lin_w": nrm(keys[7], (NUM_TAGS, CHANNEL)),
      "lin_b": nrm(keys[8], (NUM_TAGS,)),
  }


def ner_reference(params, x, seg_tags):
  feats = [jnp.take(params["char_emb"], x[:, :, 0], axis=0)]
  for i in range(1, x.shape[2]):
    feats.append(jnp.take(params["bigram_emb"], x[:, :, i], axis=0))
  feats.append(jnp.take(params["seg_emb"], seg_tags, axis=0))
  emb = jnp.concatenate(feats, axis=2).astype(jnp.float32)

  out = jnp.transpose(emb, (0, 2, 1))  # NCH (torch layout)

  def conv(o, w, bias, d):
    pad = d * (w.shape[-1] - 1) // 2
    y = lax.conv_general_dilated(o, w, window_strides=(1,),
                                 padding=[(pad, pad)], rhs_dilation=(d,),
                                 dimension_numbers=("NCH", "OIH", "NCH"))
    return y + bias[None, :, None]

  out = conv(out, params["conv0_w"], params["conv0_b"], 1)
  for _ in range(NUM_BLOCK):
    for li, d in enumerate(BLOCK_DILATIONS):
      out = conv(out, params["block_w"][li], params["block_b"][li], d)
  out = jnp.transpose(out, (0, 2, 1))
  logits = out @ params["lin_w"].T + params["lin_b"]
  pred = jnp.argmax(jax.nn.softmax(logits, axis=-1), axis=-1)
  return logits, pred


if __name__ == "__main__":
  key = jax.random.PRNGKey(0)
  pkey, k1, k2, k3 = jax.random.split(key, 4)
  params = init_params(pkey)
  prep = prepare_params(params)  # one-time weight/table re-layout

  x = jax.random.randint(k1, (B, S, 1 + NUM_BIGRAM_FEATS), 0, CHAR_VOCAB,
                         dtype=jnp.int32)
  x = x.at[:, :, 1:].set(
      jax.random.randint(k2, (B, S, NUM_BIGRAM_FEATS), 0, BIGRAM_VOCAB,
                         dtype=jnp.int32))
  seg_tags = jax.random.randint(k3, (B, S), 0, SEG_VOCAB, dtype=jnp.int32)
  masks = jnp.ones((B, S), dtype=jnp.bool_)  # unused in non-CRF decode

  logits, pred = ner_forward(prep, x, seg_tags, masks)
  jax.block_until_ready((logits, pred))

  ref_logits, ref_pred = ner_reference(params, x, seg_tags)
  np.testing.assert_allclose(np.asarray(logits), np.asarray(ref_logits),
                             rtol=2e-4, atol=2e-4)
  assert np.array_equal(np.asarray(pred), np.asarray(ref_pred))
  print("KERNEL_OK")
</pallas_src>

<mosaic_0001>
module attributes {stable_mosaic.version = 11 : i64} {
  func.func @ner_kernel(%arg0: i32, %arg1: memref<32x3xi32, #tpu.memory_space<vmem>>, %arg2: memref<32x1xi32, #tpu.memory_space<vmem>>, %arg3: memref<175x40xf32, #tpu.memory_space<vmem>>, %arg4: memref<3x40x32xf32, #tpu.memory_space<vmem>>, %arg5: memref<1x32xf32, #tpu.memory_space<vmem>>, %arg6: memref<3x3x32x32xf32, #tpu.memory_space<vmem>>, %arg7: memref<3x1x32xf32, #tpu.memory_space<vmem>>, %arg8: memref<32x8xf32, #tpu.memory_space<vmem>>, %arg9: memref<1x8xf32, #tpu.memory_space<vmem>>, %arg10: memref<32x8xf32, #tpu.memory_space<vmem>>, %arg11: memref<32x1xi32, #tpu.memory_space<vmem>>, %arg12: memref<48x40xf32, #tpu.memory_space<vmem>>) attributes {dimension_semantics = [#tpu.dimension_semantics<arbitrary>], iteration_bounds = array<i64: 1>, scalar_prefetch = 0 : i64, scratch_operands = 1 : i64, tpu.core_type = #tpu.core_type<tc>, window_params = [{pipeline_mode = #tpu.pipeline_mode<synchronous>, transform_indices = @transform_0, window_bounds = array<i64: 32, 3>}, {pipeline_mode = #tpu.pipeline_mode<synchronous>, transform_indices = @transform_1, window_bounds = array<i64: 32, 1>}, {pipeline_mode = #tpu.pipeline_mode<synchronous>, transform_indices = @transform_2, window_bounds = array<i64: 175, 40>}, {pipeline_mode = #tpu.pipeline_mode<synchronous>, transform_indices = @transform_3, window_bounds = array<i64: 3, 40, 32>}, {pipeline_mode = #tpu.pipeline_mode<synchronous>, transform_indices = @transform_4, window_bounds = array<i64: 1, 32>}, {pipeline_mode = #tpu.pipeline_mode<synchronous>, transform_indices = @transform_5, window_bounds = array<i64: 3, 3, 32, 32>}, {pipeline_mode = #tpu.pipeline_mode<synchronous>, transform_indices = @transform_6, window_bounds = array<i64: 3, 1, 32>}, {pipeline_mode = #tpu.pipeline_mode<synchronous>, transform_indices = @transform_7, window_bounds = array<i64: 32, 8>}, {pipeline_mode = #tpu.pipeline_mode<synchronous>, transform_indices = @transform_8, window_bounds = array<i64: 1, 8>}, {pipeline_mode = #tpu.pipeline_mode<synchronous>, transform_indices = @transform_9, window_bounds = array<i64: 32, 8>}, {pipeline_mode = #tpu.pipeline_mode<synchronous>, transform_indices = @transform_10, window_bounds = array<i64: 32, 1>}]} {
    %cst = arith.constant 0.000000e+00 : f32
    %0 = vector.broadcast %cst : f32 to vector<48x40xf32>
    %c0 = arith.constant 0 : index
    %c0_0 = arith.constant 0 : index
    %1 = vector.load %arg12[%c0, %c0_0] : memref<48x40xf32, #tpu.memory_space<vmem>>, vector<48x40xf32>
    tpu.vector_store %arg12[%c0, %c0_0], %0 {strides = array<i32>} : memref<48x40xf32, #tpu.memory_space<vmem>>, vector<48x40xf32>,
    %c0_1 = arith.constant 0 : index
    %c0_2 = arith.constant 0 : index
    %2 = vector.load %arg1[%c0_1, %c0_2] : memref<32x3xi32, #tpu.memory_space<vmem>>, vector<32x3xi32>
    %c0_3 = arith.constant 0 : index
    %c0_4 = arith.constant 0 : index
    %3 = vector.load %arg2[%c0_3, %c0_4] : memref<32x1xi32, #tpu.memory_space<vmem>>, vector<32x1xi32>
    %4 = tpu.iota {dimensions = array<i32: 1>} : vector<32x175xi32>
    %5 = vector.extract_strided_slice %2 {offsets = [0, 0], sizes = [32, 1], strides = [1, 1]} : vector<32x3xi32> to vector<32x1xi32>
    %6 = vector.broadcast %5 : vector<32x1xi32> to vector<32x175xi32>
    %7 = arith.cmpi eq, %6, %4 : vector<32x175xi32>
    %8 = vector.extract_strided_slice %2 {offsets = [0, 1], sizes = [32, 1], strides = [1, 1]} : vector<32x3xi32> to vector<32x1xi32>
    %c50_i32 = arith.constant 50 : i32
    %9 = vector.broadcast %c50_i32 : i32 to vector<32x1xi32>
    %10 = arith.addi %8, %9 : vector<32x1xi32>
    %11 = vector.broadcast %10 : vector<32x1xi32> to vector<32x175xi32>
    %12 = arith.cmpi eq, %11, %4 : vector<32x175xi32>
    %13 = arith.ori %7, %12 : vector<32x175xi1>
    %14 = vector.extract_strided_slice %2 {offsets = [0, 2], sizes = [32, 1], strides = [1, 1]} : vector<32x3xi32> to vector<32x1xi32>
    %c50_i32_5 = arith.constant 50 : i32
    %15 = vector.broadcast %c50_i32_5 : i32 to vector<32x1xi32>
    %16 = arith.addi %14, %15 : vector<32x1xi32>
    %c60_i32 = arith.constant 60 : i32
    %17 = vector.broadcast %c60_i32 : i32 to vector<32x1xi32>
    %18 = arith.addi %16, %17 : vector<32x1xi32>
    %19 = vector.broadcast %18 : vector<32x1xi32> to vector<32x175xi32>
    %20 = arith.cmpi eq, %19, %4 : vector<32x175xi32>
    %21 = arith.ori %13, %20 : vector<32x175xi1>
    %c50_i32_6 = arith.constant 50 : i32
    %22 = vector.broadcast %c50_i32_6 : i32 to vector<32x1xi32>
    %23 = arith.addi %3, %22 : vector<32x1xi32>
    %c120_i32 = arith.constant 120 : i32
    %24 = vector.broadcast %c120_i32 : i32 to vector<32x1xi32>
    %25 = arith.addi %23, %24 : vector<32x1xi32>
    %26 = vector.broadcast %25 : vector<32x1xi32> to vector<32x175xi32>
    %27 = arith.cmpi eq, %26, %4 : vector<32x175xi32>
    %28 = arith.ori %21, %27 : vector<32x175xi1>
    %29 = arith.extui %28 : vector<32x175xi1> to vector<32x175xi32>
    %30 = arith.sitofp %29 : vector<32x175xi32> to vector<32x175xf32>
    %c0_7 = arith.constant 0 : index
    %c0_8 = arith.constant 0 : index
    %31 = vector.load %arg3[%c0_7, %c0_8] : memref<175x40xf32, #tpu.memory_space<vmem>>, vector<175x40xf32>
    %cst_9 = arith.constant dense<0.000000e+00> : vector<32x40xf32>
    %32 = tpu.matmul %30, %31, %cst_9 {dimension_numbers = #tpu.dot_dimension_numbers<[1], [0], [0], [1], [0, 0, 1, 1], [], []>} : vector<32x175xf32>, vector<175x40xf32>, vector<32x40xf32> -> vector<32x40xf32>
    %33 = tpu.iota {dimensions = array<i32: 0>} : vector<16x1xi32>
    %34 = tpu.concatenate %33, %33 in 0 : vector<16x1xi32>, vector<16x1xi32> -> vector<32x1xi32>
    %c0_10 = arith.constant 0 : index
    %c0_11 = arith.constant 0 : index
    %35 = vector.load %arg5[%c0_10, %c0_11] : memref<1x32xf32, #tpu.memory_space<vmem>>, vector<1x32xf32>
    %c8 = arith.constant 8 : index
    %c0_12 = arith.constant 0 : index
    %36 = vector.load %arg12[%c8, %c0_12] : memref<48x40xf32, #tpu.memory_space<vmem>>, vector<32x40xf32>
    tpu.vector_store %arg12[%c8, %c0_12], %32 {strides = array<i32>} : memref<48x40xf32, #tpu.memory_space<vmem>>, vector<32x40xf32>,
    %c1 = arith.constant 1 : index
    %c0_13 = arith.constant 0 : index
    %c0_14 = arith.constant 0 : index
    %37 = vector.load %arg4[%c1, %c0_13, %c0_14] : memref<3x40x32xf32, #tpu.memory_space<vmem>>, vector<1x40x32xf32>
    %38 = vector.shape_cast %37 : vector<1x40x32xf32> to vector<40x32xf32>
    %cst_15 = arith.constant dense<0.000000e+00> : vector<32x32xf32>
    %39 = tpu.matmul %32, %38, %cst_15 {dimension_numbers = #tpu.dot_dimension_numbers<[1], [0], [0], [1], [0, 0, 1, 1], [], []>} : vector<32x40xf32>, vector<40x32xf32>, vector<32x32xf32> -> vector<32x32xf32>
    %40 = vector.broadcast %35 : vector<1x32xf32> to vector<32x32xf32>
    %41 = arith.addf %39, %40 : vector<32x32xf32>
    %c7 = arith.constant 7 : index
    %c0_16 = arith.constant 0 : index
    %42 = vector.load %arg12[%c7, %c0_16] : memref<48x40xf32, #tpu.memory_space<vmem>>, vector<32x40xf32>
    %c1_i32 = arith.constant 1 : i32
    %43 = vector.broadcast %c1_i32 : i32 to vector<32x1xi32>
    %44 = arith.cmpi sge, %34, %43 : vector<32x1xi32>
    %cst_17 = arith.constant 0.000000e+00 : f32
    %45 = vector.shape_cast %44 : vector<32x1xi1> to vector<32x1xi1>
    %46 = vector.broadcast %45 : vector<32x1xi1> to vector<32x40xi1>
    %47 = vector.broadcast %cst_17 : f32 to vector<32x40xf32>
    %48 = arith.select %46, %42, %47 : vector<32x40xi1>, vector<32x40xf32>
    %c0_18 = arith.constant 0 : index
    %c0_19 = arith.constant 0 : index
    %c0_20 = arith.constant 0 : index
    %49 = vector.load %arg4[%c0_18, %c0_19, %c0_20] : memref<3x40x32xf32, #tpu.memory_space<vmem>>, vector<1x40x32xf32>
    %50 = vector.shape_cast %49 : vector<1x40x32xf32> to vector<40x32xf32>
    %cst_21 = arith.constant dense<0.000000e+00> : vector<32x32xf32>
    %51 = tpu.matmul %48, %50, %cst_21 {dimension_numbers = #tpu.dot_dimension_numbers<[1], [0], [0], [1], [0, 0, 1, 1], [], []>} : vector<32x40xf32>, vector<40x32xf32>, vector<32x32xf32> -> vector<32x32xf32>
    %52 = arith.addf %41, %51 : vector<32x32xf32>
    %c9 = arith.constant 9 : index
    %c0_22 = arith.constant 0 : index
    %53 = vector.load %arg12[%c9, %c0_22] : memref<48x40xf32, #tpu.memory_space<vmem>>, vector<32x40xf32>
    %c15_i32 = arith.constant 15 : i32
    %54 = vector.broadcast %c15_i32 : i32 to vector<32x1xi32>
    %55 = arith.cmpi slt, %34, %54 : vector<32x1xi32>
    %cst_23 = arith.constant 0.000000e+00 : f32
    %56 = vector.shape_cast %55 : vector<32x1xi1> to vector<32x1xi1>
    %57 = vector.broadcast %56 : vector<32x1xi1> to vector<32x40xi1>
    %58 = vector.broadcast %cst_23 : f32 to vector<32x40xf32>
    %59 = arith.select %57, %53, %58 : vector<32x40xi1>, vector<32x40xf32>
    %c2 = arith.constant 2 : index
    %c0_24 = arith.constant 0 : index
    %c0_25 = arith.constant 0 : index
    %60 = vector.load %arg4[%c2, %c0_24, %c0_25] : memref<3x40x32xf32, #tpu.memory_space<vmem>>, vector<1x40x32xf32>
    %61 = vector.shape_cast %60 : vector<1x40x32xf32> to vector<40x32xf32>
    %cst_26 = arith.constant dense<0.000000e+00> : vector<32x32xf32>
    %62 = tpu.matmul %59, %61, %cst_26 {dimension_numbers = #tpu.dot_dimension_numbers<[1], [0], [0], [1], [0, 0, 1, 1], [], []>} : vector<32x40xf32>, vector<40x32xf32>, vector<32x32xf32> -> vector<32x32xf32>
    %63 = arith.addf %52, %62 : vector<32x32xf32>
    %c0_27 = arith.constant 0 : index
    %c0_28 = arith.constant 0 : index
    %c0_29 = arith.constant 0 : index
    %64 = vector.load %arg7[%c0_27, %c0_28, %c0_29] : memref<3x1x32xf32, #tpu.memory_space<vmem>>, vector<1x1x32xf32>
    %65 = vector.shape_cast %64 : vector<1x1x32xf32> to vector<1x32xf32>
    %c8_30 = arith.constant 8 : index
    %c0_31 = arith.constant 0 : index
    %66 = vector.load %arg12[%c8_30, %c0_31] : memref<48x40xf32, #tpu.memory_space<vmem>>, vector<32x32xf32>
    tpu.vector_store %arg12[%c8_30, %c0_31], %63 {strides = array<i32>} : memref<48x40xf32, #tpu.memory_space<vmem>>, vector<32x32xf32>,
    %c0_32 = arith.constant 0 : index
    %c1_33 = arith.constant 1 : index
    %c0_34 = arith.constant 0 : index
    %c0_35 = arith.constant 0 : index
    %67 = vector.load %arg6[%c0_32, %c1_33, %c0_34, %c0_35] : memref<3x3x32x32xf32, #tpu.memory_space<vmem>>, vector<1x1x32x32xf32>
    %68 = vector.shape_cast %67 : vector<1x1x32x32xf32> to vector<32x32xf32>
    %cst_36 = arith.constant dense<0.000000e+00> : vector<32x32xf32>
    %69 = tpu.matmul %63, %68, %cst_36 {dimension_numbers = #tpu.dot_dimension_numbers<[1], [0], [0], [1], [0, 0, 1, 1], [], []>} : vector<32x32xf32>, vector<32x32xf32>, vector<32x32xf32> -> vector<32x32xf32>
    %70 = vector.broadcast %65 : vector<1x32xf32> to vector<32x32xf32>
    %71 = arith.addf %69, %70 : vector<32x32xf32>
    %c7_37 = arith.constant 7 : index
    %c0_38 = arith.constant 0 : index
    %72 = vector.load %arg12[%c7_37, %c0_38] : memref<48x40xf32, #tpu.memory_space<vmem>>, vector<32x32xf32>
    %c1_i32_39 = arith.constant 1 : i32
    %73 = vector.broadcast %c1_i32_39 : i32 to vector<32x1xi32>
    %74 = arith.cmpi sge, %34, %73 : vector<32x1xi32>
    %cst_40 = arith.constant 0.000000e+00 : f32
    %75 = vector.shape_cast %74 : vector<32x1xi1> to vector<32x1xi1>
    %76 = vector.broadcast %75 : vector<32x1xi1> to vector<32x32xi1>
    %77 = vector.broadcast %cst_40 : f32 to vector<32x32xf32>
    %78 = arith.select %76, %72, %77 : vector<32x32xi1>, vector<32x32xf32>
    %c0_41 = arith.constant 0 : index
    %c0_42 = arith.constant 0 : index
    %c0_43 = arith.constant 0 : index
    %c0_44 = arith.constant 0 : index
    %79 = vector.load %arg6[%c0_41, %c0_42, %c0_43, %c0_44] : memref<3x3x32x32xf32, #tpu.memory_space<vmem>>, vector<1x1x32x32xf32>
    %80 = vector.shape_cast %79 : vector<1x1x32x32xf32> to vector<32x32xf32>
    %cst_45 = arith.constant dense<0.000000e+00> : vector<32x32xf32>
    %81 = tpu.matmul %78, %80, %cst_45 {dimension_numbers = #tpu.dot_dimension_numbers<[1], [0], [0], [1], [0, 0, 1, 1], [], []>} : vector<32x32xf32>, vector<32x32xf32>, vector<32x32xf32> -> vector<32x32xf32>
    %82 = arith.addf %71, %81 : vector<32x32xf32>
    %c9_46 = arith.constant 9 : index
    %c0_47 = arith.constant 0 : index
    %83 = vector.load %arg12[%c9_46, %c0_47] : memref<48x40xf32, #tpu.memory_space<vmem>>, vector<32x32xf32>
    %c15_i32_48 = arith.constant 15 : i32
    %84 = vector.broadcast %c15_i32_48 : i32 to vector<32x1xi32>
    %85 = arith.cmpi slt, %34, %84 : vector<32x1xi32>
    %cst_49 = arith.constant 0.000000e+00 : f32
    %86 = vector.shape_cast %85 : vector<32x1xi1> to vector<32x1xi1>
    %87 = vector.broadcast %86 : vector<32x1xi1> to vector<32x32xi1>
    %88 = vector.broadcast %cst_49 : f32 to vector<32x32xf32>
    %89 = arith.select %87, %83, %88 : vector<32x32xi1>, vector<32x32xf32>
    %c0_50 = arith.constant 0 : index
    %c2_51 = arith.constant 2 : index
    %c0_52 = arith.constant 0 : index
    %c0_53 = arith.constant 0 : index
    %90 = vector.load %arg6[%c0_50, %c2_51, %c0_52, %c0_53] : memref<3x3x32x32xf32, #tpu.memory_space<vmem>>, vector<1x1x32x32xf32>
    %91 = vector.shape_cast %90 : vector<1x1x32x32xf32> to vector<32x32xf32>
    %cst_54 = arith.constant dense<0.000000e+00> : vector<32x32xf32>
    %92 = tpu.matmul %89, %91, %cst_54 {dimension_numbers = #tpu.dot_dimension_numbers<[1], [0], [0], [1], [0, 0, 1, 1], [], []>} : vector<32x32xf32>, vector<32x32xf32>, vector<32x32xf32> -> vector<32x32xf32>
    %93 = arith.addf %82, %92 : vector<32x32xf32>
    %c1_55 = arith.constant 1 : index
    %c0_56 = arith.constant 0 : index
    %c0_57 = arith.constant 0 : index
    %94 = vector.load %arg7[%c1_55, %c0_56, %c0_57] : memref<3x1x32xf32, #tpu.memory_space<vmem>>, vector<1x1x32xf32>
    %95 = vector.shape_cast %94 : vector<1x1x32xf32> to vector<1x32xf32>
    %c8_58 = arith.constant 8 : index
    %c0_59 = arith.constant 0 : index
    %96 = vector.load %arg12[%c8_58, %c0_59] : memref<48x40xf32, #tpu.memory_space<vmem>>, vector<32x32xf32>
    tpu.vector_store %arg12[%c8_58, %c0_59], %93 {strides = array<i32>} : memref<48x40xf32, #tpu.memory_space<vmem>>, vector<32x32xf32>,
    %c1_60 = arith.constant 1 : index
    %c1_61 = arith.constant 1 : index
    %c0_62 = arith.constant 0 : index
    %c0_63 = arith.constant 0 : index
    %97 = vector.load %arg6[%c1_60, %c1_61, %c0_62, %c0_63] : memref<3x3x32x32xf32, #tpu.memory_space<vmem>>, vector<1x1x32x32xf32>
    %98 = vector.shape_cast %97 : vector<1x1x32x32xf32> to vector<32x32xf32>
    %cst_64 = arith.constant dense<0.000000e+00> : vector<32x32xf32>
    %99 = tpu.matmul %93, %98, %cst_64 {dimension_numbers = #tpu.dot_dimension_numbers<[1], [0], [0], [1], [0, 0, 1, 1], [], []>} : vector<32x32xf32>, vector<32x32xf32>, vector<32x32xf32> -> vector<32x32xf32>
    %100 = vector.broadcast %95 : vector<1x32xf32> to vector<32x32xf32>
    %101 = arith.addf %99, %100 : vector<32x32xf32>
    %c6 = arith.constant 6 : index
    %c0_65 = arith.constant 0 : index
    %102 = vector.load %arg12[%c6, %c0_65] : memref<48x40xf32, #tpu.memory_space<vmem>>, vector<32x32xf32>
    %c2_i32 = arith.constant 2 : i32
    %103 = vector.broadcast %c2_i32 : i32 to vector<32x1xi32>
    %104 = arith.cmpi sge, %34, %103 : vector<32x1xi32>
    %cst_66 = arith.constant 0.000000e+00 : f32
    %105 = vector.shape_cast %104 : vector<32x1xi1> to vector<32x1xi1>
    %106 = vector.broadcast %105 : vector<32x1xi1> to vector<32x32xi1>
    %107 = vector.broadcast %cst_66 : f32 to vector<32x32xf32>
    %108 = arith.select %106, %102, %107 : vector<32x32xi1>, vector<32x32xf32>
    %c1_67 = arith.constant 1 : index
    %c0_68 = arith.constant 0 : index
    %c0_69 = arith.constant 0 : index
    %c0_70 = arith.constant 0 : index
    %109 = vector.load %arg6[%c1_67, %c0_68, %c0_69, %c0_70] : memref<3x3x32x32xf32, #tpu.memory_space<vmem>>, vector<1x1x32x32xf32>
    %110 = vector.shape_cast %109 : vector<1x1x32x32xf32> to vector<32x32xf32>
    %cst_71 = arith.constant dense<0.000000e+00> : vector<32x32xf32>
    %111 = tpu.matmul %108, %110, %cst_71 {dimension_numbers = #tpu.dot_dimension_numbers<[1], [0], [0], [1], [0, 0, 1, 1], [], []>} : vector<32x32xf32>, vector<32x32xf32>, vector<32x32xf32> -> vector<32x32xf32>
    %112 = arith.addf %101, %111 : vector<32x32xf32>
    %c10 = arith.constant 10 : index
    %c0_72 = arith.constant 0 : index
    %113 = vector.load %arg12[%c10, %c0_72] : memref<48x40xf32, #tpu.memory_space<vmem>>, vector<32x32xf32>
    %c14_i32 = arith.constant 14 : i32
    %114 = vector.broadcast %c14_i32 : i32 to vector<32x1xi32>
    %115 = arith.cmpi slt, %34, %114 : vector<32x1xi32>
    %cst_73 = arith.constant 0.000000e+00 : f32
    %116 = vector.shape_cast %115 : vector<32x1xi1> to vector<32x1xi1>
    %117 = vector.broadcast %116 : vector<32x1xi1> to vector<32x32xi1>
    %118 = vector.broadcast %cst_73 : f32 to vector<32x32xf32>
    %119 = arith.select %117, %113, %118 : vector<32x32xi1>, vector<32x32xf32>
    %c1_74 = arith.constant 1 : index
    %c2_75 = arith.constant 2 : index
    %c0_76 = arith.constant 0 : index
    %c0_77 = arith.constant 0 : index
    %120 = vector.load %arg6[%c1_74, %c2_75, %c0_76, %c0_77] : memref<3x3x32x32xf32, #tpu.memory_space<vmem>>, vector<1x1x32x32xf32>
    %121 = vector.shape_cast %120 : vector<1x1x32x32xf32> to vector<32x32xf32>
    %cst_78 = arith.constant dense<0.000000e+00> : vector<32x32xf32>
    %122 = tpu.matmul %119, %121, %cst_78 {dimension_numbers = #tpu.dot_dimension_numbers<[1], [0], [0], [1], [0, 0, 1, 1], [], []>} : vector<32x32xf32>, vector<32x32xf32>, vector<32x32xf32> -> vector<32x32xf32>
    %123 = arith.addf %112, %122 : vector<32x32xf32>
    %c2_79 = arith.constant 2 : index
    %c0_80 = arith.constant 0 : index
    %c0_81 = arith.constant 0 : index
    %124 = vector.load %arg7[%c2_79, %c0_80, %c0_81] : memref<3x1x32xf32, #tpu.memory_space<vmem>>, vector<1x1x32xf32>
    %125 = vector.shape_cast %124 : vector<1x1x32xf32> to vector<1x32xf32>
    %c8_82 = arith.constant 8 : index
    %c0_83 = arith.constant 0 : index
    %126 = vector.load %arg12[%c8_82, %c0_83] : memref<48x40xf32, #tpu.memory_space<vmem>>, vector<32x32xf32>
    tpu.vector_store %arg12[%c8_82, %c0_83], %123 {strides = array<i32>} : memref<48x40xf32, #tpu.memory_space<vmem>>, vector<32x32xf32>,
    %c2_84 = arith.constant 2 : index
    %c1_85 = arith.constant 1 : index
    %c0_86 = arith.constant 0 : index
    %c0_87 = arith.constant 0 : index
    %127 = vector.load %arg6[%c2_84, %c1_85, %c0_86, %c0_87] : memref<3x3x32x32xf32, #tpu.memory_space<vmem>>, vector<1x1x32x32xf32>
    %128 = vector.shape_cast %127 : vector<1x1x32x32xf32> to vector<32x32xf32>
    %cst_88 = arith.constant dense<0.000000e+00> : vector<32x32xf32>
    %129 = tpu.matmul %123, %128, %cst_88 {dimension_numbers = #tpu.dot_dimension_numbers<[1], [0], [0], [1], [0, 0, 1, 1], [], []>} : vector<32x32xf32>, vector<32x32xf32>, vector<32x32xf32> -> vector<32x32xf32>
    %130 = vector.broadcast %125 : vector<1x32xf32> to vector<32x32xf32>
    %131 = arith.addf %129, %130 : vector<32x32xf32>
    %c7_89 = arith.constant 7 : index
    %c0_90 = arith.constant 0 : index
    %132 = vector.load %arg12[%c7_89, %c0_90] : memref<48x40xf32, #tpu.memory_space<vmem>>, vector<32x32xf32>
    %c1_i32_91 = arith.constant 1 : i32
    %133 = vector.broadcast %c1_i32_91 : i32 to vector<32x1xi32>
    %134 = arith.cmpi sge, %34, %133 : vector<32x1xi32>
    %cst_92 = arith.constant 0.000000e+00 : f32
    %135 = vector.shape_cast %134 : vector<32x1xi1> to vector<32x1xi1>
    %136 = vector.broadcast %135 : vector<32x1xi1> to vector<32x32xi1>
    %137 = vector.broadcast %cst_92 : f32 to vector<32x32xf32>
    %138 = arith.select %136, %132, %137 : vector<32x32xi1>, vector<32x32xf32>
    %c2_93 = arith.constant 2 : index
    %c0_94 = arith.constant 0 : index
    %c0_95 = arith.constant 0 : index
    %c0_96 = arith.constant 0 : index
    %139 = vector.load %arg6[%c2_93, %c0_94, %c0_95, %c0_96] : memref<3x3x32x32xf32, #tpu.memory_space<vmem>>, vector<1x1x32x32xf32>
    %140 = vector.shape_cast %139 : vector<1x1x32x32xf32> to vector<32x32xf32>
    %cst_97 = arith.constant dense<0.000000e+00> : vector<32x32xf32>
    %141 = tpu.matmul %138, %140, %cst_97 {dimension_numbers = #tpu.dot_dimension_numbers<[1], [0], [0], [1], [0, 0, 1, 1], [], []>} : vector<32x32xf32>, vector<32x32xf32>, vector<32x32xf32> -> vector<32x32xf32>
    %142 = arith.addf %131, %141 : vector<32x32xf32>
    %c9_98 = arith.constant 9 : index
    %c0_99 = arith.constant 0 : index
    %143 = vector.load %arg12[%c9_98, %c0_99] : memref<48x40xf32, #tpu.memory_space<vmem>>, vector<32x32xf32>
    %c15_i32_100 = arith.constant 15 : i32
    %144 = vector.broadcast %c15_i32_100 : i32 to vector<32x1xi32>
    %145 = arith.cmpi slt, %34, %144 : vector<32x1xi32>
    %cst_101 = arith.constant 0.000000e+00 : f32
    %146 = vector.shape_cast %145 : vector<32x1xi1> to vector<32x1xi1>
    %147 = vector.broadcast %146 : vector<32x1xi1> to vector<32x32xi1>
    %148 = vector.broadcast %cst_101 : f32 to vector<32x32xf32>
    %149 = arith.select %147, %143, %148 : vector<32x32xi1>, vector<32x32xf32>
    %c2_102 = arith.constant 2 : index
    %c2_103 = arith.constant 2 : index
    %c0_104 = arith.constant 0 : index
    %c0_105 = arith.constant 0 : index
    %150 = vector.load %arg6[%c2_102, %c2_103, %c0_104, %c0_105] : memref<3x3x32x32xf32, #tpu.memory_space<vmem>>, vector<1x1x32x32xf32>
    %151 = vector.shape_cast %150 : vector<1x1x32x32xf32> to vector<32x32xf32>
    %cst_106 = arith.constant dense<0.000000e+00> : vector<32x32xf32>
    %152 = tpu.matmul %149, %151, %cst_106 {dimension_numbers = #tpu.dot_dimension_numbers<[1], [0], [0], [1], [0, 0, 1, 1], [], []>} : vector<32x32xf32>, vector<32x32xf32>, vector<32x32xf32> -> vector<32x32xf32>
    %153 = arith.addf %142, %152 : vector<32x32xf32>
    %c0_107 = arith.constant 0 : index
    %c0_108 = arith.constant 0 : index
    %c0_109 = arith.constant 0 : index
    %154 = vector.load %arg7[%c0_107, %c0_108, %c0_109] : memref<3x1x32xf32, #tpu.memory_space<vmem>>, vector<1x1x32xf32>
    %155 = vector.shape_cast %154 : vector<1x1x32xf32> to vector<1x32xf32>
    %c8_110 = arith.constant 8 : index
    %c0_111 = arith.constant 0 : index
    %156 = vector.load %arg12[%c8_110, %c0_111] : memref<48x40xf32, #tpu.memory_space<vmem>>, vector<32x32xf32>
    tpu.vector_store %arg12[%c8_110, %c0_111], %153 {strides = array<i32>} : memref<48x40xf32, #tpu.memory_space<vmem>>, vector<32x32xf32>,
    %c0_112 = arith.constant 0 : index
    %c1_113 = arith.constant 1 : index
    %c0_114 = arith.constant 0 : index
    %c0_115 = arith.constant 0 : index
    %157 = vector.load %arg6[%c0_112, %c1_113, %c0_114, %c0_115] : memref<3x3x32x32xf32, #tpu.memory_space<vmem>>, vector<1x1x32x32xf32>
    %158 = vector.shape_cast %157 : vector<1x1x32x32xf32> to vector<32x32xf32>
    %cst_116 = arith.constant dense<0.000000e+00> : vector<32x32xf32>
    %159 = tpu.matmul %153, %158, %cst_116 {dimension_numbers = #tpu.dot_dimension_numbers<[1], [0], [0], [1], [0, 0, 1, 1], [], []>} : vector<32x32xf32>, vector<32x32xf32>, vector<32x32xf32> -> vector<32x32xf32>
    %160 = vector.broadcast %155 : vector<1x32xf32> to vector<32x32xf32>
    %161 = arith.addf %159, %160 : vector<32x32xf32>
    %c7_117 = arith.constant 7 : index
    %c0_118 = arith.constant 0 : index
    %162 = vector.load %arg12[%c7_117, %c0_118] : memref<48x40xf32, #tpu.memory_space<vmem>>, vector<32x32xf32>
    %c1_i32_119 = arith.constant 1 : i32
    %163 = vector.broadcast %c1_i32_119 : i32 to vector<32x1xi32>
    %164 = arith.cmpi sge, %34, %163 : vector<32x1xi32>
    %cst_120 = arith.constant 0.000000e+00 : f32
    %165 = vector.shape_cast %164 : vector<32x1xi1> to vector<32x1xi1>
    %166 = vector.broadcast %165 : vector<32x1xi1> to vector<32x32xi1>
    %167 = vector.broadcast %cst_120 : f32 to vector<32x32xf32>
    %168 = arith.select %166, %162, %167 : vector<32x32xi1>, vector<32x32xf32>
    %c0_121 = arith.constant 0 : index
    %c0_122 = arith.constant 0 : index
    %c0_123 = arith.constant 0 : index
    %c0_124 = arith.constant 0 : index
    %169 = vector.load %arg6[%c0_121, %c0_122, %c0_123, %c0_124] : memref<3x3x32x32xf32, #tpu.memory_space<vmem>>, vector<1x1x32x32xf32>
    %170 = vector.shape_cast %169 : vector<1x1x32x32xf32> to vector<32x32xf32>
    %cst_125 = arith.constant dense<0.000000e+00> : vector<32x32xf32>
    %171 = tpu.matmul %168, %170, %cst_125 {dimension_numbers = #tpu.dot_dimension_numbers<[1], [0], [0], [1], [0, 0, 1, 1], [], []>} : vector<32x32xf32>, vector<32x32xf32>, vector<32x32xf32> -> vector<32x32xf32>
    %172 = arith.addf %161, %171 : vector<32x32xf32>
    %c9_126 = arith.constant 9 : index
    %c0_127 = arith.constant 0 : index
    %173 = vector.load %arg12[%c9_126, %c0_127] : memref<48x40xf32, #tpu.memory_space<vmem>>, vector<32x32xf32>
    %c15_i32_128 = arith.constant 15 : i32
    %174 = vector.broadcast %c15_i32_128 : i32 to vector<32x1xi32>
    %175 = arith.cmpi slt, %34, %174 : vector<32x1xi32>
    %cst_129 = arith.constant 0.000000e+00 : f32
    %176 = vector.shape_cast %175 : vector<32x1xi1> to vector<32x1xi1>
    %177 = vector.broadcast %176 : vector<32x1xi1> to vector<32x32xi1>
    %178 = vector.broadcast %cst_129 : f32 to vector<32x32xf32>
    %179 = arith.select %177, %173, %178 : vector<32x32xi1>, vector<32x32xf32>
    %c0_130 = arith.constant 0 : index
    %c2_131 = arith.constant 2 : index
    %c0_132 = arith.constant 0 : index
    %c0_133 = arith.constant 0 : index
    %180 = vector.load %arg6[%c0_130, %c2_131, %c0_132, %c0_133] : memref<3x3x32x32xf32, #tpu.memory_space<vmem>>, vector<1x1x32x32xf32>
    %181 = vector.shape_cast %180 : vector<1x1x32x32xf32> to vector<32x32xf32>
    %cst_134 = arith.constant dense<0.000000e+00> : vector<32x32xf32>
    %182 = tpu.matmul %179, %181, %cst_134 {dimension_numbers = #tpu.dot_dimension_numbers<[1], [0], [0], [1], [0, 0, 1, 1], [], []>} : vector<32x32xf32>, vector<32x32xf32>, vector<32x32xf32> -> vector<32x32xf32>
    %183 = arith.addf %172, %182 : vector<32x32xf32>
    %c1_135 = arith.constant 1 : index
    %c0_136 = arith.constant 0 : index
    %c0_137 = arith.constant 0 : index
    %184 = vector.load %arg7[%c1_135, %c0_136, %c0_137] : memref<3x1x32xf32, #tpu.memory_space<vmem>>, vector<1x1x32xf32>
    %185 = vector.shape_cast %184 : vector<1x1x32xf32> to vector<1x32xf32>
    %c8_138 = arith.constant 8 : index
    %c0_139 = arith.constant 0 : index
    %186 = vector.load %arg12[%c8_138, %c0_139] : memref<48x40xf32, #tpu.memory_space<vmem>>, vector<32x32xf32>
    tpu.vector_store %arg12[%c8_138, %c0_139], %183 {strides = array<i32>} : memref<48x40xf32, #tpu.memory_space<vmem>>, vector<32x32xf32>,
    %c1_140 = arith.constant 1 : index
    %c1_141 = arith.constant 1 : index
    %c0_142 = arith.constant 0 : index
    %c0_143 = arith.constant 0 : index
    %187 = vector.load %arg6[%c1_140, %c1_141, %c0_142, %c0_143] : memref<3x3x32x32xf32, #tpu.memory_space<vmem>>, vector<1x1x32x32xf32>
    %188 = vector.shape_cast %187 : vector<1x1x32x32xf32> to vector<32x32xf32>
    %cst_144 = arith.constant dense<0.000000e+00> : vector<32x32xf32>
    %189 = tpu.matmul %183, %188, %cst_144 {dimension_numbers = #tpu.dot_dimension_numbers<[1], [0], [0], [1], [0, 0, 1, 1], [], []>} : vector<32x32xf32>, vector<32x32xf32>, vector<32x32xf32> -> vector<32x32xf32>
    %190 = vector.broadcast %185 : vector<1x32xf32> to vector<32x32xf32>
    %191 = arith.addf %189, %190 : vector<32x32xf32>
    %c6_145 = arith.constant 6 : index
    %c0_146 = arith.constant 0 : index
    %192 = vector.load %arg12[%c6_145, %c0_146] : memref<48x40xf32, #tpu.memory_space<vmem>>, vector<32x32xf32>
    %c2_i32_147 = arith.constant 2 : i32
    %193 = vector.broadcast %c2_i32_147 : i32 to vector<32x1xi32>
    %194 = arith.cmpi sge, %34, %193 : vector<32x1xi32>
    %cst_148 = arith.constant 0.000000e+00 : f32
    %195 = vector.shape_cast %194 : vector<32x1xi1> to vector<32x1xi1>
    %196 = vector.broadcast %195 : vector<32x1xi1> to vector<32x32xi1>
    %197 = vector.broadcast %cst_148 : f32 to vector<32x32xf32>
    %198 = arith.select %196, %192, %197 : vector<32x32xi1>, vector<32x32xf32>
    %c1_149 = arith.constant 1 : index
    %c0_150 = arith.constant 0 : index
    %c0_151 = arith.constant 0 : index
    %c0_152 = arith.constant 0 : index
    %199 = vector.load %arg6[%c1_149, %c0_150, %c0_151, %c0_152] : memref<3x3x32x32xf32, #tpu.memory_space<vmem>>, vector<1x1x32x32xf32>
    %200 = vector.shape_cast %199 : vector<1x1x32x32xf32> to vector<32x32xf32>
    %cst_153 = arith.constant dense<0.000000e+00> : vector<32x32xf32>
    %201 = tpu.matmul %198, %200, %cst_153 {dimension_numbers = #tpu.dot_dimension_numbers<[1], [0], [0], [1], [0, 0, 1, 1], [], []>} : vector<32x32xf32>, vector<32x32xf32>, vector<32x32xf32> -> vector<32x32xf32>
    %202 = arith.addf %191, %201 : vector<32x32xf32>
    %c10_154 = arith.constant 10 : index
    %c0_155 = arith.constant 0 : index
    %203 = vector.load %arg12[%c10_154, %c0_155] : memref<48x40xf32, #tpu.memory_space<vmem>>, vector<32x32xf32>
    %c14_i32_156 = arith.constant 14 : i32
    %204 = vector.broadcast %c14_i32_156 : i32 to vector<32x1xi32>
    %205 = arith.cmpi slt, %34, %204 : vector<32x1xi32>
    %cst_157 = arith.constant 0.000000e+00 : f32
    %206 = vector.shape_cast %205 : vector<32x1xi1> to vector<32x1xi1>
    %207 = vector.broadcast %206 : vector<32x1xi1> to vector<32x32xi1>
    %208 = vector.broadcast %cst_157 : f32 to vector<32x32xf32>
    %209 = arith.select %207, %203, %208 : vector<32x32xi1>, vector<32x32xf32>
    %c1_158 = arith.constant 1 : index
    %c2_159 = arith.constant 2 : index
    %c0_160 = arith.constant 0 : index
    %c0_161 = arith.constant 0 : index
    %210 = vector.load %arg6[%c1_158, %c2_159, %c0_160, %c0_161] : memref<3x3x32x32xf32, #tpu.memory_space<vmem>>, vector<1x1x32x32xf32>
    %211 = vector.shape_cast %210 : vector<1x1x32x32xf32> to vector<32x32xf32>
    %cst_162 = arith.constant dense<0.000000e+00> : vector<32x32xf32>
    %212 = tpu.matmul %209, %211, %cst_162 {dimension_numbers = #tpu.dot_dimension_numbers<[1], [0], [0], [1], [0, 0, 1, 1], [], []>} : vector<32x32xf32>, vector<32x32xf32>, vector<32x32xf32> -> vector<32x32xf32>
    %213 = arith.addf %202, %212 : vector<32x32xf32>
    %c2_163 = arith.constant 2 : index
    %c0_164 = arith.constant 0 : index
    %c0_165 = arith.constant 0 : index
    %214 = vector.load %arg7[%c2_163, %c0_164, %c0_165] : memref<3x1x32xf32, #tpu.memory_space<vmem>>, vector<1x1x32xf32>
    %215 = vector.shape_cast %214 : vector<1x1x32xf32> to vector<1x32xf32>
    %c8_166 = arith.constant 8 : index
    %c0_167 = arith.constant 0 : index
    %216 = vector.load %arg12[%c8_166, %c0_167] : memref<48x40xf32, #tpu.memory_space<vmem>>, vector<32x32xf32>
    tpu.vector_store %arg12[%c8_166, %c0_167], %213 {strides = array<i32>} : memref<48x40xf32, #tpu.memory_space<vmem>>, vector<32x32xf32>,
    %c2_168 = arith.constant 2 : index
    %c1_169 = arith.constant 1 : index
    %c0_170 = arith.constant 0 : index
    %c0_171 = arith.constant 0 : index
    %217 = vector.load %arg6[%c2_168, %c1_169, %c0_170, %c0_171] : memref<3x3x32x32xf32, #tpu.memory_space<vmem>>, vector<1x1x32x32xf32>
    %218 = vector.shape_cast %217 : vector<1x1x32x32xf32> to vector<32x32xf32>
    %cst_172 = arith.constant dense<0.000000e+00> : vector<32x32xf32>
    %219 = tpu.matmul %213, %218, %cst_172 {dimension_numbers = #tpu.dot_dimension_numbers<[1], [0], [0], [1], [0, 0, 1, 1], [], []>} : vector<32x32xf32>, vector<32x32xf32>, vector<32x32xf32> -> vector<32x32xf32>
    %220 = vector.broadcast %215 : vector<1x32xf32> to vector<32x32xf32>
    %221 = arith.addf %219, %220 : vector<32x32xf32>
    %c7_173 = arith.constant 7 : index
    %c0_174 = arith.constant 0 : index
    %222 = vector.load %arg12[%c7_173, %c0_174] : memref<48x40xf32, #tpu.memory_space<vmem>>, vector<32x32xf32>
    %c1_i32_175 = arith.constant 1 : i32
    %223 = vector.broadcast %c1_i32_175 : i32 to vector<32x1xi32>
    %224 = arith.cmpi sge, %34, %223 : vector<32x1xi32>
    %cst_176 = arith.constant 0.000000e+00 : f32
    %225 = vector.shape_cast %224 : vector<32x1xi1> to vector<32x1xi1>
    %226 = vector.broadcast %225 : vector<32x1xi1> to vector<32x32xi1>
    %227 = vector.broadcast %cst_176 : f32 to vector<32x32xf32>
    %228 = arith.select %226, %222, %227 : vector<32x32xi1>, vector<32x32xf32>
    %c2_177 = arith.constant 2 : index
    %c0_178 = arith.constant 0 : index
    %c0_179 = arith.constant 0 : index
    %c0_180 = arith.constant 0 : index
    %229 = vector.load %arg6[%c2_177, %c0_178, %c0_179, %c0_180] : memref<3x3x32x32xf32, #tpu.memory_space<vmem>>, vector<1x1x32x32xf32>
    %230 = vector.shape_cast %229 : vector<1x1x32x32xf32> to vector<32x32xf32>
    %cst_181 = arith.constant dense<0.000000e+00> : vector<32x32xf32>
    %231 = tpu.matmul %228, %230, %cst_181 {dimension_numbers = #tpu.dot_dimension_numbers<[1], [0], [0], [1], [0, 0, 1, 1], [], []>} : vector<32x32xf32>, vector<32x32xf32>, vector<32x32xf32> -> vector<32x32xf32>
    %232 = arith.addf %221, %231 : vector<32x32xf32>
    %c9_182 = arith.constant 9 : index
    %c0_183 = arith.constant 0 : index
    %233 = vector.load %arg12[%c9_182, %c0_183] : memref<48x40xf32, #tpu.memory_space<vmem>>, vector<32x32xf32>
    %c15_i32_184 = arith.constant 15 : i32
    %234 = vector.broadcast %c15_i32_184 : i32 to vector<32x1xi32>
    %235 = arith.cmpi slt, %34, %234 : vector<32x1xi32>
    %cst_185 = arith.constant 0.000000e+00 : f32
    %236 = vector.shape_cast %235 : vector<32x1xi1> to vector<32x1xi1>
    %237 = vector.broadcast %236 : vector<32x1xi1> to vector<32x32xi1>
    %238 = vector.broadcast %cst_185 : f32 to vector<32x32xf32>
    %239 = arith.select %237, %233, %238 : vector<32x32xi1>, vector<32x32xf32>
    %c2_186 = arith.constant 2 : index
    %c2_187 = arith.constant 2 : index
    %c0_188 = arith.constant 0 : index
    %c0_189 = arith.constant 0 : index
    %240 = vector.load %arg6[%c2_186, %c2_187, %c0_188, %c0_189] : memref<3x3x32x32xf32, #tpu.memory_space<vmem>>, vector<1x1x32x32xf32>
    %241 = vector.shape_cast %240 : vector<1x1x32x32xf32> to vector<32x32xf32>
    %cst_190 = arith.constant dense<0.000000e+00> : vector<32x32xf32>
    %242 = tpu.matmul %239, %241, %cst_190 {dimension_numbers = #tpu.dot_dimension_numbers<[1], [0], [0], [1], [0, 0, 1, 1], [], []>} : vector<32x32xf32>, vector<32x32xf32>, vector<32x32xf32> -> vector<32x32xf32>
    %243 = arith.addf %232, %242 : vector<32x32xf32>
    %c0_191 = arith.constant 0 : index
    %c0_192 = arith.constant 0 : index
    %244 = vector.load %arg8[%c0_191, %c0_192] : memref<32x8xf32, #tpu.memory_space<vmem>>, vector<32x8xf32>
    %cst_193 = arith.constant dense<0.000000e+00> : vector<32x8xf32>
    %245 = tpu.matmul %243, %244, %cst_193 {dimension_numbers = #tpu.dot_dimension_numbers<[1], [0], [0], [1], [0, 0, 1, 1], [], []>} : vector<32x32xf32>, vector<32x8xf32>, vector<32x8xf32> -> vector<32x8xf32>
    %c0_194 = arith.constant 0 : index
    %c0_195 = arith.constant 0 : index
    %246 = vector.load %arg9[%c0_194, %c0_195] : memref<1x8xf32, #tpu.memory_space<vmem>>, vector<1x8xf32>
    %247 = vector.broadcast %246 : vector<1x8xf32> to vector<32x8xf32>
    %248 = arith.addf %245, %247 : vector<32x8xf32>
    %c0_196 = arith.constant 0 : index
    %c0_197 = arith.constant 0 : index
    %249 = vector.load %arg10[%c0_196, %c0_197] : memref<32x8xf32, #tpu.memory_space<vmem>>, vector<32x8xf32>
    tpu.vector_store %arg10[%c0_196, %c0_197], %248 {strides = array<i32>} : memref<32x8xf32, #tpu.memory_space<vmem>>, vector<32x8xf32>,
    %cst_198 = arith.constant dense<0xFF800000> : vector<32xf32>
    %250 = vector.multi_reduction <maximumf>, %248, %cst_198 [1] : vector<32x8xf32> to vector<32xf32>
    %251 = vector.shape_cast %250 : vector<32xf32> to vector<32x1xf32>
    %252 = tpu.iota {dimensions = array<i32: 1>} : vector<32x8xi32>
    %253 = vector.broadcast %251 : vector<32x1xf32> to vector<32x8xf32>
    %254 = arith.cmpf oge, %248, %253 : vector<32x8xf32>
    %c8_i32 = arith.constant 8 : i32
    %255 = vector.broadcast %c8_i32 : i32 to vector<32x8xi32>
    %256 = arith.select %254, %252, %255 : vector<32x8xi1>, vector<32x8xi32>
    %cst_199 = arith.constant dense<2147483647> : vector<32xi32>
    %257 = vector.multi_reduction <minsi>, %256, %cst_199 [1] : vector<32x8xi32> to vector<32xi32>
    %258 = vector.shape_cast %257 : vector<32xi32> to vector<32x1xi32>
    %c0_200 = arith.constant 0 : index
    %c0_201 = arith.constant 0 : index
    %259 = vector.load %arg11[%c0_200, %c0_201] : memref<32x1xi32, #tpu.memory_space<vmem>>, vector<32x1xi32>
    tpu.vector_store %arg11[%c0_200, %c0_201], %258 {strides = array<i32>} : memref<32x1xi32, #tpu.memory_space<vmem>>, vector<32x1xi32>,
    return
  }
  func.func @transform_0(%arg0: i32) -> (i32, i32) {
    %c0_i32 = arith.constant 0 : i32
    %c0_i32_0 = arith.constant 0 : i32
    %c0_i32_1 = arith.constant 0 : i32
    return %c0_i32, %c0_i32_0 : i32, i32
  }
  func.func @transform_1(%arg0: i32) -> (i32, i32) {
    %c0_i32 = arith.constant 0 : i32
    %c0_i32_0 = arith.constant 0 : i32
    %c0_i32_1 = arith.constant 0 : i32
    return %c0_i32, %c0_i32_0 : i32, i32
  }
  func.func @transform_2(%arg0: i32) -> (i32, i32) {
    %c0_i32 = arith.constant 0 : i32
    %c0_i32_0 = arith.constant 0 : i32
    %c0_i32_1 = arith.constant 0 : i32
    return %c0_i32, %c0_i32_0 : i32, i32
  }
  func.func @transform_3(%arg0: i32) -> (i32, i32, i32) {
    %c0_i32 = arith.constant 0 : i32
    %c0_i32_0 = arith.constant 0 : i32
    %c0_i32_1 = arith.constant 0 : i32
    %c0_i32_2 = arith.constant 0 : i32
    return %c0_i32, %c0_i32_0, %c0_i32_1 : i32, i32, i32
  }
  func.func @transform_4(%arg0: i32) -> (i32, i32) {
    %c0_i32 = arith.constant 0 : i32
    %c0_i32_0 = arith.constant 0 : i32
    %c0_i32_1 = arith.constant 0 : i32
    return %c0_i32, %c0_i32_0 : i32, i32
  }
  func.func @transform_5(%arg0: i32) -> (i32, i32, i32, i32) {
    %c0_i32 = arith.constant 0 : i32
    %c0_i32_0 = arith.constant 0 : i32
    %c0_i32_1 = arith.constant 0 : i32
    %c0_i32_2 = arith.constant 0 : i32
    %c0_i32_3 = arith.constant 0 : i32
    return %c0_i32, %c0_i32_0, %c0_i32_1, %c0_i32_2 : i32, i32, i32, i32
  }
  func.func @transform_6(%arg0: i32) -> (i32, i32, i32) {
    %c0_i32 = arith.constant 0 : i32
    %c0_i32_0 = arith.constant 0 : i32
    %c0_i32_1 = arith.constant 0 : i32
    %c0_i32_2 = arith.constant 0 : i32
    return %c0_i32, %c0_i32_0, %c0_i32_1 : i32, i32, i32
  }
  func.func @transform_7(%arg0: i32) -> (i32, i32) {
    %c0_i32 = arith.constant 0 : i32
    %c0_i32_0 = arith.constant 0 : i32
    %c0_i32_1 = arith.constant 0 : i32
    return %c0_i32, %c0_i32_0 : i32, i32
  }
  func.func @transform_8(%arg0: i32) -> (i32, i32) {
    %c0_i32 = arith.constant 0 : i32
    %c0_i32_0 = arith.constant 0 : i32
    %c0_i32_1 = arith.constant 0 : i32
    return %c0_i32, %c0_i32_0 : i32, i32
  }
  func.func @transform_9(%arg0: i32) -> (i32, i32) {
    %c0_i32 = arith.constant 0 : i32
    %c0_i32_0 = arith.constant 0 : i32
    %c0_i32_1 = arith.constant 0 : i32
    return %c0_i32, %c0_i32_0 : i32, i32
  }
  func.func @transform_10(%arg0: i32) -> (i32, i32) {
    %c0_i32 = arith.constant 0 : i32
    %c0_i32_0 = arith.constant 0 : i32
    %c0_i32_1 = arith.constant 0 : i32
    return %c0_i32, %c0_i32_0 : i32, i32
  }
}

</mosaic_0001>

<bundles_post_ra>
// kernel: ner_forward.1
= control target key start
LH: loop header
LB: loop body
LE: loop exit
PB: predicated region body
PF: predicated region fallthrough
CT: control target
= control target key end

     0   :  { %v3949_v0 = vmov 1   ;;  %v3950_v2 = vmov 2   ;;  %v3951_v6 = vmov 0.0|0.0   ;;  %v3952_v21 = vmov 0   ;;  %s4816_s0 = inlined_call_operand.vmem [shape: s32[32,3], index: 0, kind: input, shape index: {}]   ;;  %s4817_s1 = inlined_call_operand.vmem [shape: s32[32,1], index: 1, kind: input, shape index: {}]   ;;  %s4818_s2 = inlined_call_operand.vmem [shape: f32[175,40], index: 2, kind: input, shape index: {}]   ;;  %s4819_s3 = inlined_call_operand.vmem [shape: f32[3,40,32], index: 3, kind: input, shape index: {}]   ;;  %s4820_s5 = inlined_call_operand.vmem [shape: f32[3,3,32,32], index: 5, kind: input, shape index: {}]   ;;  %s4821_s4 = inlined_call_operand.vmem [shape: f32[1,32], index: 4, kind: input, shape index: {}]   ;;  %s4822_s6 = inlined_call_operand.vmem [shape: f32[3,1,32], index: 6, kind: input, shape index: {}]   ;;  %s4823_s7 = inlined_call_operand.vmem [shape: f32[32,8], index: 7, kind: input, shape index: {}]   ;;  %s4824_s8 = inlined_call_operand.vmem [shape: f32[1,8], index: 8, kind: input, shape index: {}]   ;;  %s4825_s9 = inlined_call_operand.vmem [shape: f32[32,8], index: 9, kind: output, shape index: {0}]   ;;  %s4826_s10 = inlined_call_operand.vmem [shape: s32[32,1], index: 10, kind: output, shape index: {1}]  }
   0x1   :  { %3936 = vset.pattern.permute.xlu0 %v3949_v0  ;;  %v41_v1 = vld [vmem:[%s4816_s0] sm:$0xff]  ;;  %3937 = vset.pattern.permute.xlu1 %v3950_v2  ;;  %v42_v3 = vld [vmem:[%s4816_s0 + $0x8] sm:$0xff]  ;;  %v190_v12 = vld [vmem:[%s4818_s2 + $0x10] sm:$0xff]  ;;  %vm223_vm0 = vcmask 1046528   ;;  %vm3953_vm1 = vmmov 1   ;;  %v49_v61 = vlaneseq  ;;  %vm4827_vm5 = vcmask 326656  }
   0x2   :  { %v45_v4 = vld [vmem:[%s4817_s1] sm:$0xff]  ;;  %v72_v5 = vadd.s32 50, %v41_v1  ;;  %3635 = vmatprep.subr.bf16.mxu0 %v3951_v6  ;;  %v73_v9 = vadd.s32 50, %v42_v3  ;;  %v189_v11 = vld [vmem:[%s4818_s2 + $0x8] sm:$0xff]  ;;  %v191_v13 = vld [vmem:[%s4818_s2 + $0x18] sm:$0xff] }
   0x3   :  { %v136_v7 = vadd.s32 50, %v45_v4  ;;  %v188_v10 = vld [vmem:[%s4818_s2] sm:$0xff]  ;;  %v46_v14 = vld [vmem:[%s4817_s1 + $0x8] sm:$0xff]  ;;  %v3639_v17 = vpack.c.bf16 %v191_v13, %v190_v12  ;;  %v43_v24 = vld [vmem:[%s4816_s0 + $0x10] sm:$0xff]  ;;  %v313_v62 = vshrl.u32 %v49_v61, 7 }
   0x4   :  { %77 = vperm.xlu0 %3936, %v72_v5   ;;  %v104_v8 = vadd.s32 60, %v72_v5  ;;  %v3636_v15 = vpack.c.bf16 %v189_v11, %v188_v10  ;;  %v137_v18 = vadd.s32 50, %v46_v14  ;;  %v192_v19 = vld [vmem:[%s4818_s2 + $0x20] sm:$0xff]  ;;  %v193_v20 = vld [vmem:[%s4818_s2 + $0x28] sm:$0xff]  ;;  %v194_v25 = vld [vmem:[%s4818_s2 + $0x30] sm:$0xff]  ;;  %v74_v27 = vadd.s32 50, %v43_v24 }
   0x5   :  { %v140_v16 = vadd.s32 120, %v136_v7  ;;  %v3642_v22 = vpack.c.bf16 %v193_v20, %v192_v19  ;;  %v195_v26 = vld [vmem:[%s4818_s2 + $0x38] sm:$0xff]  ;;  %v105_v28 = vadd.s32 60, %v73_v9  ;;  %v196_v30 = vld [vmem:[%s4818_s2 + $0x40] sm:$0xff]  ;;  %v197_v31 = vld [vmem:[%s4818_s2 + $0x48] sm:$0xff]  ;;  %vm1141_vm3 = vcmp.ge.s32.totalorder %v313_v62, 2 }
   0x6   :  { %109 = vperm.xlu1 %3937, %v104_v8   ;;  %3637 = vmatpush1.bf16.msra.mxu0 %v3636_v15  ;;  %v141_v23 = vadd.s32 120, %v137_v18  ;;  %v3645_v29 = vpack.c.bf16 %v195_v26, %v194_v25  ;;  %v106_v32 = vadd.s32 60, %v74_v27  ;;  %v44_v33 = vld [vmem:[%s4816_s0 + $0x18] sm:$0xff]  ;;  %v3648_v34 = vpack.c.bf16 %v197_v31, %v196_v30  ;;  %v198_v35 = vld [vmem:[%s4818_s2 + $0x50] sm:$0xff]  ;;  %v200_v40 = vld [vmem:[%s4818_s2 + $0x60] sm:$0xff] }
   0x7   :  { %3638 = vmatprep.subr.bf16.mxu0 %v3951_v6  ;;  %v199_v36 = vld [vmem:[%s4818_s2 + $0x58] sm:$0xff]  ;;  %v75_v37 = vadd.s32 50, %v44_v33  ;;  %v47_v38 = vld [vmem:[%s4817_s1 + $0x10] sm:$0xff]  ;;  %v201_v41 = vld [vmem:[%s4818_s2 + $0x68] sm:$0xff]  ;;  %v1143_v63 = vsel %vm1141_vm3, 1, %v3952_v21  ;;  %vm433_vm4 = vcmp.ge.s32.totalorder %v313_v62, 1 }
   0x8   :  { %80 = vperm.xlu0 %3936, %v73_v9   ;;  %v3651_v39 = vpack.c.bf16 %v199_v36, %v198_v35  ;;  %v138_v42 = vadd.s32 50, %v47_v38  ;;  %v3654_v43 = vpack.c.bf16 %v201_v41, %v200_v40  ;;  %v202_v44 = vld [vmem:[%s4818_s2 + $0x70] sm:$0xff]  ;;  %v203_v45 = vld [vmem:[%s4818_s2 + $0x78] sm:$0xff]  ;;  %v204_v48 = vld [vmem:[%s4818_s2 + $0x80] sm:$0xff]  ;;  %v3954_v5 = vmov 0.0  }
   0x9   :  { %v3657_v47 = vpack.c.bf16 %v203_v45, %v202_v44  ;;  %v205_v49 = vld [vmem:[%s4818_s2 + $0x88] sm:$0xff]  ;;  %v206_v51 = vld [vmem:[%s4818_s2 + $0x90] sm:$0xff]  ;;  %v207_v52 = vld [vmem:[%s4818_s2 + $0x98] sm:$0xff]  ;;  %v107_v54 = vadd.s32 60, %v75_v37  ;;  %36 = vst.msk [vmem:[#allocation2 + $0x8] sm:$0xff] %vm4827_vm5, %v3954_v5  ;;  %v4151_v11 = vand.u32 127, %v49_v61 }
   0xa   :  { %3938 = vset.pattern.permute.xlu1 %v3952_v21  ;;  %3640 = vmatpush1.bf16.msra.mxu0 %v3639_v17  ;;  %v142_v46 = vadd.s32 120, %v138_v42  ;;  %v3660_v50 = vpack.c.bf16 %v205_v49, %v204_v48  ;;  %v48_v53 = vld [vmem:[%s4817_s1 + $0x18] sm:$0xff]  ;;  %v3663_v55 = vpack.c.bf16 %v207_v52, %v206_v51  ;;  %v208_v57 = vld [vmem:[%s4818_s2 + $0xa0] sm:$0xff]  ;;  %v209_v58 = vld [vmem:[%s4818_s2 + $0xa8] sm:$0x7f]  ;;  %35 = vst.msk [vmem:[#allocation2] sm:$0xff] %vm4827_vm5, %v3954_v5 }
   0xb   :  { %145 = vperm.xlu1 %3938, %v140_v16   ;;  %3641 = vmatprep.subr.bf16.mxu0 %v3951_v6  ;;  %v139_v56 = vadd.s32 50, %v48_v53  ;;  %v3666_v59 = vpack.c.bf16 %v209_v58, %v208_v57  ;;  %vm3667_vm2 = vmpackc.low %vm223_vm0, %vm3953_vm1  ;;  %v2969_v4 = vld [vmem:[%s4819_s3 + $0x30] sm:$0xff]  ;;  %37 = vst.msk [vmem:[#allocation2 + $0x10] sm:$0xff] %vm4827_vm5, %v3954_v5  ;;  %v4154_v14 = vadd.s32 128, %v4151_v11  ;;  %v2972_v36 = vld [vmem:[%s4819_s3 + $0x48] sm:$0xff] }
   0xc   :  { %3939 = vset.pattern.permute.xlu0 %v3952_v21  ;;  %38 = vst.msk [vmem:[#allocation2 + $0x18] sm:$0xff] %vm4827_vm5, %v3954_v5  ;;  %39 = vst.msk [vmem:[#allocation2 + $0x20] sm:$0xff] %vm4827_vm5, %v3954_v5  ;;  %v450_v38 = vld [vmem:[%s4819_s3 + $0x8] sm:$0xff]  ;;  %v451_v42 = vld [vmem:[%s4819_s3 + $0x10] sm:$0xff] }
   0xd   :  { %53 = vperm.xlu0 %3939, %v41_v1   ;;  %v143_v60 = vadd.s32 120, %v139_v56  ;;  %v314_v1 = vadd.s32 8, %v313_v62  ;;  %40 = vst.msk [vmem:[#allocation2 + $0x28] sm:$0xff] %vm4827_vm5, %v3954_v5  ;;  %v2982_v48 = vld [vmem:[%s4819_s3 + $0x50] sm:$0xff]  ;;  %v2983_v49 = vld [vmem:[%s4819_s3 + $0x58] sm:$0xff]  ;;  %v2984_v57 = vld [vmem:[%s4819_s3 + $0x60] sm:$0xff] }
   0xe   :  { %3643 = vmatpush1.bf16.msra.mxu0 %v3642_v22  ;;  %v2985_v58 = vld [vmem:[%s4819_s3 + $0x68] sm:$0xff] }
   0xf   :  { %56 = vperm.xlu1 %3938, %v42_v3   ;;  %3644 = vmatprep.subr.bf16.mxu0 %v3951_v6  ;;  %v2968_v3 = vld [vmem:[%s4819_s3 + $0x28] sm:$0xff]  ;;  %vm560_vm6 = vcmp.lt.s32.totalorder %v314_v1, 15  ;;  %vm1268_vm7 = vcmp.lt.s32.totalorder %v314_v1, 14 }
  0x10   :  { %v562_v7 = vsel %vm560_vm6, 1, %v3952_v21  ;;  %v1270_v8 = vsel %vm1268_vm7, 1, %v3952_v21 }
  0x11   :  { %148 = vperm.xlu0 %3939, %v141_v23  }
  0x12   :  { %3646 = vmatpush1.bf16.msra.mxu0 %v3645_v29 }
  0x13   :  { %3940 = vset.pattern.permute.xlu1 %v3950_v2  ;;  %3647 = vmatprep.subr.bf16.mxu0 %v3951_v6 }
  0x14   :  { %112 = vperm.xlu1 %3940, %v105_v28  }
  0x15   :  { %3943 = vset.pattern.permute.xlu0 %v3950_v2 }
  0x16   :  { %115 = vperm.xlu0 %3943, %v106_v32   ;;  %3649 = vmatpush1.bf16.msra.mxu0 %v3648_v34  ;;  %v2971_v34 = vld [vmem:[%s4819_s3 + $0x40] sm:$0xff] }
  0x17   :  { %3650 = vmatprep.subr.bf16.mxu0 %v3951_v6 }
  0x18   :  { %3941 = vset.pattern.permute.xlu1 %v3952_v21 }
  0x19   :  { %59 = vperm.xlu1 %3941, %v43_v24  }
  0x1a   :  { %3945 = vset.pattern.permute.xlu0 %v3949_v0  ;;  %3652 = vmatpush1.bf16.msra.mxu0 %v3651_v39 }
  0x1b   :  { %86 = vperm.xlu0 %3945, %v75_v37   ;;  %3653 = vmatprep.subr.bf16.mxu0 %v3951_v6  ;;  %v449_v37 = vld [vmem:[%s4819_s3] sm:$0xff] }
  0x1c   :  { %v3677_v39 = vpack.c.bf16 %v450_v38, %v449_v37  ;;  %v3004_v37 = vld [vmem:[%s4820_s5 + $0x40] sm:$0xff]  ;;  %v3005_v38 = vld [vmem:[%s4820_s5 + $0x48] sm:$0xff] }
  0x1d   :  { %3942 = vset.pattern.permute.xlu1 %v3949_v0 }
  0x1e   :  { %83 = vperm.xlu1 %3942, %v74_v27   ;;  %3655 = vmatpush1.bf16.msra.mxu0 %v3654_v43  ;;  %v452_v43 = vld [vmem:[%s4819_s3 + $0x18] sm:$0xff] }
  0x1f   :  { %3948 = vset.pattern.permute.xlu0 %v3952_v21  ;;  %3656 = vmatprep.subr.bf16.mxu0 %v3951_v6  ;;  %v3681_v44 = vpack.c.bf16 %v452_v43, %v451_v42  ;;  %v4354_v42 = vpack.c.bf16 %v3005_v38, %v3004_v37  ;;  %v3006_v43 = vld [vmem:[%s4820_s5 + $0x50] sm:$0xff] }
  0x22   :  { %3944 = vset.pattern.permute.xlu1 %v3952_v21  ;;  %3658 = vmatpush1.bf16.msra.mxu0 %v3657_v47  ;;  %v453_v47 = vld [vmem:[%s4819_s3 + $0x20] sm:$0xff] }
  0x23   :  { %151 = vperm.xlu1 %3944, %v142_v46   ;;  %3659 = vmatprep.subr.bf16.mxu0 %v3951_v6 }
  0x26   :  { %3661 = vmatpush1.bf16.msra.mxu0 %v3660_v50  ;;  %v3685_v50 = vpack.c.bf16 %v2983_v49, %v2982_v48 }
  0x27   :  { %62 = vperm.xlu1 %3944, %v44_v33   ;;  %3662 = vmatprep.subr.bf16.mxu0 %v3951_v6  ;;  %v2970_v33 = vld [vmem:[%s4819_s3 + $0x38] sm:$0xff] }
  0x28   :  { %v3673_v35 = vpack.c.bf16 %v2971_v34, %v2970_v33 }
  0x2a   :  { %3664 = vmatpush1.bf16.msra.mxu0 %v3663_v55 }
  0x2b   :  { %3946 = vset.pattern.permute.xlu1 %v3950_v2  ;;  %3665 = vmatprep.subr.bf16.mxu0 %v3951_v6  ;;  %v435_v2 = vsel %vm433_vm4, 1, %v3952_v21  ;;  %v3669_v6 = vpack.c.bf16 %v2969_v4, %v2968_v3  ;;  %v2986_v4 = vld [vmem:[%s4819_s3 + $0x70] sm:$0xff] }
  0x2c   :  { %118 = vperm.xlu1 %3946, %v107_v54   ;;  %438 = vperm.xlu0 %3948, %v435_v2  }
  0x2d   :  { %3670 = vmatprep.subr.bf16.mxu1 %v3669_v6 }
  0x2e   :  { %3668 = vmatpush1.bf16.msk.msra.mxu0 %vm3667_vm2, %v3666_v59  ;;  %3672 = vmatpush3.bf16.msra.mxu1 %v3669_v6 }
  0x2f   :  { %3674 = vmatprep.subr.bf16.mxu1 %v3673_v35 }
  0x30   :  { %3947 = vset.pattern.permute.xlu1 %v3952_v21  ;;  %567 = vperm.xlu0 %3948, %v562_v7   ;;  %v3955_v21 = vmov 1.0  }
  0x31   :  { %154 = vperm.xlu1 %3947, %v143_v60  }
  0x32   :  { %3676 = vmatpush3.bf16.msra.mxu1 %v3673_v35 }
  0x33   :  { %3329 = vmatprep.subr.mxu1 %v2972_v36 }
  0x34   :  { %1149 = vperm.xlu0 %3948, %v3949_v0  }
  0x35   :  { %441 = vperm.xlu1 %3947, %v3949_v0  }
  0x36   :  { %3330 = vmatpush3.msra.mxu1 %v2972_v36 }
  0x37   :  { %3678 = vmatprep.subr.bf16.mxu1 %v3677_v39 }
  0x38   :  { %1275 = vperm.xlu0 %3948, %v1270_v8  }
  0x39   :  { %564 = vperm.xlu1 %3947, %v3949_v0  }
  0x3d   :  { %1146 = vperm.xlu1 %3947, %v1143_v63   ;;  %v3689_v63 = vpack.c.bf16 %v2985_v58, %v2984_v57 }
  0x41   :  { %1272 = vperm.xlu1 %3947, %v3949_v0  }
  0x83   :  { %v78_v9 = vpop.permute.xlu0 %77 }
  0x84   :  { %vm88_vm8 = vcmp.eq.s32.totalorder %v78_v9, %v4151_v11  ;;  %vm89_vm9 = vcmp.eq.s32.totalorder %v78_v9, %v4154_v14  ;;  %v2992_v9 = vld [vmem:[%s4820_s5 + $0x28] sm:$0xff] }
  0x85   :  { %v110_v10 = vpop.permute.xlu1 %109 }
  0x86   :  { %vm120_vm15 = vcmp.eq.s32.totalorder %v110_v10, %v4151_v11  ;;  %vm121_vm2 = vcmp.eq.s32.totalorder %v110_v10, %v4154_v14 }
  0x87   :  { %v81_v12 = vpop.permute.xlu0 %80 }
  0x88   :  { %vm90_vm13 = vcmp.eq.s32.totalorder %v81_v12, %v4151_v11  ;;  %vm91_vm3 = vcmp.eq.s32.totalorder %v81_v12, %v4154_v14 }
  0x8a   :  { %v146_v13 = vpop.permute.xlu1 %145 }
  0x8b   :  { %vm157_vm7 = vcmp.eq.s32.totalorder %v146_v13, %v4154_v14 }
  0x8c   :  { %v54_v15 = vpop.permute.xlu0 %53 }
  0x8d   :  { %vm64_vm10 = vcmp.eq.s32.totalorder %v54_v15, %v4151_v11  ;;  %vm65_vm11 = vcmp.eq.s32.totalorder %v54_v15, %v4154_v14 }
  0x8e   :  { %vm96_vm12 = vmor %vm64_vm10, %vm88_vm8  ;;  %v57_v0 = vpop.permute.xlu1 %56  ;;  %vm210_vm10 = vcmask 384000  }
  0x8f   :  { %vm66_vm14 = vcmp.eq.s32.totalorder %v57_v0, %v4151_v11  ;;  %vm97_vm0 = vmor %vm65_vm11, %vm89_vm9  ;;  %vm67_vm4 = vcmp.eq.s32.totalorder %v57_v0, %v4154_v14 }
  0x90   :  { %vm4163_vm1 = vmor %vm96_vm12, %vm120_vm15  ;;  %v149_v19 = vpop.permute.xlu0 %148  ;;  %vm156_vm12 = vcmp.eq.s32.totalorder %v146_v13, %v4151_v11 }
  0x91   :  { %vm4170_vm6 = vmor %vm66_vm14, %vm90_vm13  ;;  %vm159_vm14 = vcmp.eq.s32.totalorder %v149_v19, %v4154_v14 }
  0x92   :  { %vm129_vm8 = vmor %vm97_vm0, %vm121_vm2 }
  0x93   :  { %v113_v18 = vpop.permute.xlu1 %112  ;;  %vm165_vm9 = vmor %vm129_vm8, %vm157_vm7  ;;  %vm158_vm7 = vcmp.eq.s32.totalorder %v149_v19, %v4151_v11  ;;  %v2993_v19 = vld [vmem:[%s4820_s5 + $0x30] sm:$0xff] }
  0x94   :  { %vm123_vm11 = vcmp.eq.s32.totalorder %v113_v18, %v4154_v14  ;;  %vm99_vm15 = vmor %vm67_vm4, %vm91_vm3  ;;  %v2952_v20 = vsel %vm165_vm9, 1.0, %v3954_v5  ;;  %vm122_vm5 = vcmp.eq.s32.totalorder %v113_v18, %v4151_v11 }
  0x95   :  { %2960 = vmatprep.mubr.msk.f32.mxu0 %vm210_vm10, %v2952_v20  ;;  %vm164_vm13 = vmor %vm4163_vm1, %vm156_vm12  ;;  %v116_v25 = vpop.permute.xlu0 %115  ;;  %v2994_v20 = vld [vmem:[%s4820_s5 + $0x38] sm:$0xff] }
  0x96   :  { %2961 = vmatmul.mubr.msk.f32.vlgmr.msra.gmra.mrb[0].mxu0 %vm164_vm13, %v3955_v21  ;;  %vm131_vm0 = vmor %vm99_vm15, %vm123_vm11  ;;  %vm124_vm15 = vcmp.eq.s32.totalorder %v116_v25, %v4151_v11 }
  0x97   :  { %vm130_vm2 = vmor %vm4170_vm6, %vm122_vm5  ;;  %vm125_vm5 = vcmp.eq.s32.totalorder %v116_v25, %v4154_v14  ;;  %v3022_v25 = vld [vmem:[%s4820_s5 + $0x60] sm:$0xff] }
  0x98   :  { %v60_v22 = vpop.permute.xlu1 %59  ;;  %vm167_vm3 = vmor %vm131_vm0, %vm159_vm14 }
  0x99   :  { %v2954_v23 = vsel %vm167_vm3, 1.0, %v3954_v5  ;;  %vm166_vm4 = vmor %vm130_vm2, %vm158_vm7  ;;  %vm69_vm8 = vcmp.eq.s32.totalorder %v60_v22, %v4154_v14  ;;  %vm68_vm6 = vcmp.eq.s32.totalorder %v60_v22, %v4151_v11  ;;  %v804_v22 = vld [vmem:[%s4820_s5] sm:$0xff] }
  0x9a   :  { %2962 = vmatprep.mubr.msk.f32.mxu0 %vm210_vm10, %v2954_v23  ;;  %v87_v29 = vpop.permute.xlu0 %86  ;;  %v805_v23 = vld [vmem:[%s4820_s5 + $0x8] sm:$0xff] }
  0x9b   :  { %2963 = vmatmul.mubr.msk.f32.gmra.mrb[2].mxu0 %vm166_vm4, %v3955_v21  ;;  %vm94_vm4 = vcmp.eq.s32.totalorder %v87_v29, %v4151_v11 }
  0x9d   :  { %v84_v24 = vpop.permute.xlu1 %83 }
  0x9e   :  { %vm93_vm1 = vcmp.eq.s32.totalorder %v84_v24, %v4154_v14  ;;  %vm92_vm9 = vcmp.eq.s32.totalorder %v84_v24, %v4151_v11  ;;  %v4317_v24 = vpack.c.bf16 %v805_v23, %v804_v22 }
  0x9f   :  { %vm101_vm11 = vmor %vm69_vm8, %vm93_vm1  ;;  %vm95_vm8 = vcmp.eq.s32.totalorder %v87_v29, %v4154_v14 }
  0xa0   :  { %vm100_vm12 = vmor %vm68_vm6, %vm92_vm9 }
  0xa1   :  { %vm133_vm14 = vmor %vm101_vm11, %vm125_vm5 }
  0xa2   :  { %v152_v26 = vpop.permute.xlu1 %151  ;;  %vm132_vm7 = vmor %vm100_vm12, %vm124_vm15 }
  0xa3   :  { %vm161_vm13 = vcmp.eq.s32.totalorder %v152_v26, %v4154_v14  ;;  %vm160_vm0 = vcmp.eq.s32.totalorder %v152_v26, %v4151_v11  ;;  %v3023_v26 = vld [vmem:[%s4820_s5 + $0x68] sm:$0xff] }
  0xa4   :  { %vm169_vm2 = vmor %vm133_vm14, %vm161_vm13 }
  0xa5   :  { %v2956_v27 = vsel %vm169_vm2, 1.0, %v3954_v5  ;;  %vm168_vm3 = vmor %vm132_vm7, %vm160_vm0 }
  0xa6   :  { %v63_v28 = vpop.permute.xlu1 %62  ;;  %2964 = vmatprep.mubr.msk.f32.mxu0 %vm210_vm10, %v2956_v27  ;;  %v4326_v27 = vpack.c.bf16 %v3023_v26, %v3022_v25 }
  0xa7   :  { %2965 = vmatmul.mubr.msk.f32.gmra.mrb[4].mxu0 %vm168_vm3, %v3955_v21  ;;  %vm70_vm1 = vcmp.eq.s32.totalorder %v63_v28, %v4151_v11  ;;  %vm71_vm9 = vcmp.eq.s32.totalorder %v63_v28, %v4154_v14  ;;  %v2973_v28 = vld [vmem:[%s4821_s4] ss:$0 sm:$0xff] }
  0xa8   :  { %vm102_vm5 = vmor %vm70_vm1, %vm94_vm4  ;;  %3726 = vmatprep.subr.bf16.mxu0 %v4326_v27 }
  0xa9   :  { %vm103_vm6 = vmor %vm71_vm9, %vm95_vm8  ;;  %3728 = vmatpush3.bf16.msra.mxu0 %v4326_v27 }
  0xab   :  { %v119_v30 = vpop.permute.xlu1 %118  ;;  %v4244_v53 = vpop.permute.xlu0 %438 }
  0xac   :  { %vm127_vm11 = vcmp.eq.s32.totalorder %v119_v30, %v4154_v14  ;;  %vm126_vm12 = vcmp.eq.s32.totalorder %v119_v30, %v4151_v11  ;;  %v806_v30 = vld [vmem:[%s4820_s5 + $0x10] sm:$0xff] }
  0xad   :  { %vm135_vm13 = vmor %vm103_vm6, %vm127_vm11  ;;  %vm443_vm11 = vcmp.eq.s32.totalorder %v4244_v53, 1 }
  0xae   :  { %vm134_vm2 = vmor %vm102_vm5, %vm126_vm12 }
  0xaf   :  { %v4275_v7 = vpop.permute.xlu0 %567 }
  0xb0   :  { %v155_v31 = vpop.permute.xlu1 %154 }
  0xb1   :  { %vm163_vm15 = vcmp.eq.s32.totalorder %v155_v31, %v4154_v14  ;;  %vm162_vm14 = vcmp.eq.s32.totalorder %v155_v31, %v4151_v11  ;;  %v807_v31 = vld [vmem:[%s4820_s5 + $0x18] sm:$0xff] }
  0xb2   :  { %vm171_vm0 = vmor %vm135_vm13, %vm163_vm15  ;;  %v4340_v35 = vpack.c.bf16 %v807_v31, %v806_v30  ;;  %v3033_v30 = vld [vmem:[%s4820_s5 + $0xb8] sm:$0xff] }
  0xb3   :  { %v2958_v32 = vsel %vm171_vm0, 1.0, %v3954_v5  ;;  %vm170_vm7 = vmor %vm134_vm2, %vm162_vm14  ;;  %v2991_v5 = vld [vmem:[%s4820_s5 + $0x20] sm:$0xff]  ;;  %vm570_vm2 = vcmp.eq.s32.totalorder %v4275_v7, 1  ;;  %v4460_v31 = vpop.permute.xlu0 %1149 }
  0xb4   :  { %2966 = vmatprep.mubr.msk.f32.mxu0 %vm210_vm10, %v2958_v32  ;;  %vm4832_vm10 = vcmask 326656   ;;  %v4247_v55 = vpop.permute.xlu1 %441  ;;  %v4287_v14 = vpack.c.bf16 %v2992_v9, %v2991_v5  ;;  %v3015_v5 = vld [vmem:[%s4820_s5 + $0x90] sm:$0xff] }
  0xb5   :  { %2967 = vmatmul.mubr.msk.f32.gmra.mrb[6].mxu0 %vm170_vm7, %v3955_v21  ;;  %vm4833_vm3 = vmmov %vm4832_vm10  ;;  %vm444_vm15 = vcmp.eq.s32.totalorder %v4247_v55, 1  ;;  %v4307_v21 = vpack.c.bf16 %v2994_v20, %v2993_v19  ;;  %v3024_v9 = vld [vmem:[%s4820_s5 + $0x70] sm:$0xff] }
  0xb6   :  { %vm4834_vm4 = vmmov %vm4833_vm3 }
  0xb7   :  { %vm4835_vm1 = vmmov %vm4833_vm3 }
  0xb8   :  { %vm4836_vm8 = vmmov %vm4835_vm1  ;;  %v4267_v3 = vpop.permute.xlu1 %564 }
  0xb9   :  { %vm4837_vm9 = vmmov %vm4835_vm1  ;;  %vm569_vm0 = vcmp.eq.s32.totalorder %v4267_v3, 1 }
  0xba   :  { %vm4838_vm5 = vmmov %vm4835_vm1 }
  0xbb   :  { %vm4839_vm6 = vmmov %vm4835_vm1 }
  0xbc   :  { %vm4840_vm12 = vmmov %vm4835_vm1 }
  0xbd   :  { %vm4841_vm13 = vmmov %vm4835_vm1 }
  0xbe   :  { %vm4842_vm14 = vmmov %vm4835_vm1 }
  0xbf   :  { %vm4843_vm7 = vmmov %vm4835_vm1 }
 0x169   :  { %v293_v40 = vpop.f32.mrb[0].mxu0 }
 0x16a   :  { %316 = vst.msk [vmem:[#allocation2 + $0x8] sm:$0xff] %vm4832_vm10, %v293_v40  ;;  %v295_v41 = vpop.f32.mrb[1].mxu0  ;;  %3331 = vmatprep.mubr.msk.f32.mxu1 %vm4833_vm3, %v293_v40  ;;  %vm4844_vm10 = vmmov %vm4835_vm1 }
 0x16b   :  { %vm4845_vm3 = vmmov %vm4835_vm1 }
 0x16e   :  { %v298_v45 = vpop.f32.mrb[2].mxu0 }
 0x16f   :  { %317 = vst.msk [vmem:[#allocation2 + $0x10] sm:$0xff] %vm4834_vm4, %v298_v45  ;;  %v300_v46 = vpop.f32.mrb[3].mxu0  ;;  %3332 = vmatmul.mubr.msk.f32.vlgmr.msra.gmra.mrb[0].mxu1 %vm4835_vm1, %v298_v45  ;;  %vm4846_vm4 = vmmov %vm4835_vm1 }
 0x170   :  { %3680 = vmatpush3.bf16.msra.mxu1 %v3677_v39 }
 0x171   :  { %3682 = vmatprep.subr.bf16.mxu1 %v3681_v44  ;;  %v429_v54 = vld [vmem:[#allocation2 + $0x7] sm:$0xff] }
 0x172   :  { %v445_v61 = vsel %vm443_vm11, %v429_v54, 0.0 }
 0x174   :  { %3684 = vmatpush3.bf16.msra.mxu1 %v3681_v44  ;;  %v3007_v44 = vld [vmem:[%s4820_s5 + $0x58] sm:$0xff] }
 0x175   :  { %3345 = vmatprep.subr.mxu1 %v453_v47  ;;  %v4371_v49 = vpack.c.bf16 %v3007_v44, %v3006_v43 }
 0x176   :  { %v430_v59 = vld [vmem:[#allocation2 + $0xf] sm:$0xff] }
 0x177   :  { %v446_v1 = vsel %vm444_vm15, %v430_v59, 0.0  ;;  %v555_v6 = vld [vmem:[#allocation2 + $0x9] sm:$0xff] }
 0x178   :  { %3346 = vmatpush3.msra.mxu1 %v453_v47  ;;  %v571_v13 = vsel %vm569_vm0, %v555_v6, 0.0  ;;  %v3016_v6 = vld [vmem:[%s4820_s5 + $0x98] sm:$0xff] }
 0x179   :  { %3686 = vmatprep.subr.bf16.mxu1 %v3685_v50 }
 0x17a   :  { %v303_v51 = vpop.f32.mrb[4].mxu0 }
 0x17b   :  { %318 = vst.msk [vmem:[#allocation2 + $0x18] sm:$0xff] %vm4836_vm8, %v303_v51  ;;  %v305_v52 = vpop.f32.mrb[5].mxu0  ;;  %3334 = vmatprep.mubr.msk.f32.mxu1 %vm4837_vm9, %v303_v51  ;;  %vm683_vm8 = vcmask 261120   ;;  %v3014_v51 = vld [vmem:[%s4820_s5 + $0x88] sm:$0xff] }
 0x182   :  { %v431_v62 = vld [vmem:[#allocation2 + $0x17] sm:$0xff] }
 0x183   :  { %v447_v2 = vsel %vm443_vm11, %v431_v62, 0.0  ;;  %v556_v12 = vld [vmem:[#allocation2 + $0x11] sm:$0xff] }
 0x184   :  { %v572_v0 = vsel %vm570_vm2, %v556_v12, 0.0 }
 0x188   :  { %v308_v56 = vpop.f32.mrb[6].mxu0 }
 0x189   :  { %319 = vst.msk [vmem:[#allocation2 + $0x20] sm:$0xff] %vm4838_vm5, %v308_v56  ;;  %v310_v60 = vpop.f32.mrb[7].mxu0  ;;  %3335 = vmatmul.mubr.msk.f32.gmra.mrb[2].mxu1 %vm4839_vm6, %v308_v56  ;;  %vm1152_vm5 = vcmp.eq.s32.totalorder %v4460_v31, 1 }
 0x18a   :  { %3347 = vmatprep.mubr.msk.f32.mxu1 %vm4840_vm12, %v445_v61 }
 0x18d   :  { %3348 = vmatmul.mubr.msk.f32.vlgmr.msra.gmra.mrb[0].mxu1 %vm4841_vm13, %v446_v1 }
 0x18e   :  { %3688 = vmatpush3.bf16.msra.mxu1 %v3685_v50  ;;  %3350 = vmatprep.mubr.msk.f32.mxu1 %vm4842_vm14, %v447_v2  ;;  %v3013_v50 = vld [vmem:[%s4820_s5 + $0x80] sm:$0xff] }
 0x18f   :  { %3690 = vmatprep.subr.bf16.mxu1 %v3689_v63  ;;  %v4387_v59 = vpack.c.bf16 %v3014_v51, %v3013_v50 }
 0x190   :  { %v432_v8 = vld [vmem:[#allocation2 + $0x1f] sm:$0xff] }
 0x191   :  { %v448_v10 = vsel %vm444_vm15, %v432_v8, 0.0  ;;  %v557_v15 = vld [vmem:[#allocation2 + $0x19] sm:$0xff]  ;;  %v558_v17 = vld [vmem:[#allocation2 + $0x21] sm:$0xff]  ;;  %v4412_v8 = vpack.c.bf16 %v3016_v6, %v3015_v5 }
 0x192   :  { %3692 = vmatpush3.bf16.msra.mxu1 %v3689_v63  ;;  %v573_v16 = vsel %vm569_vm0, %v557_v15, 0.0  ;;  %v574_v18 = vsel %vm570_vm2, %v558_v17, 0.0  ;;  %v3031_v15 = vld [vmem:[%s4820_s5 + $0xa8] sm:$0xff]  ;;  %v4536_v6 = vld [vmem:[%s4822_s6 + $0x1] ss:$0 sm:$0xff] }
 0x193   :  { %3351 = vmatmul.mubr.msk.f32.gmra.mrb[2].mxu1 %vm4843_vm7, %v448_v10  ;;  %3361 = vmatprep.subr.mxu1 %v2986_v4  ;;  %v3025_v10 = vld [vmem:[%s4820_s5 + $0x78] sm:$0xff] }
 0x194   :  { %3363 = vmatprep.mubr.msk.f32.mxu1 %vm4844_vm10, %v571_v13  ;;  %v4422_v12 = vpack.c.bf16 %v3025_v10, %v3024_v9  ;;  %v3030_v13 = vld [vmem:[%s4820_s5 + $0xa0] sm:$0xff] }
 0x196   :  { %3362 = vmatpush3.msra.mxu1 %v2986_v4  ;;  %3730 = vmatprep.subr.bf16.mxu0 %v4422_v12 }
 0x197   :  { %3364 = vmatmul.mubr.msk.f32.vlgmr.msra.gmra.mrb[0].mxu1 %vm4845_vm3, %v572_v0  ;;  %3694 = vmatprep.subr.bf16.mxu1 %v4287_v14  ;;  %v4432_v0 = vpack.c.bf16 %v3031_v15, %v3030_v13  ;;  %v3050_v15 = vld [vmem:[%s4820_s5 + $0xd0] sm:$0xff] }
 0x198   :  { %3366 = vmatprep.mubr.msk.f32.mxu1 %vm4846_vm4, %v573_v16  ;;  %3696 = vmatpush3.bf16.msra.mxu1 %v4287_v14  ;;  %v4438_v16 = vld [vmem:[%s4822_s6] ss:$0 sm:$0xff]  ;;  %vm2938_vm4 = vcmask 7168  }
 0x199   :  { %3698 = vmatprep.subr.bf16.mxu1 %v4307_v21  ;;  %3732 = vmatpush3.bf16.msra.mxu0 %v4422_v12 }
 0x19a   :  { %3734 = vmatprep.subr.bf16.mxu0 %v4432_v0 }
 0x19b   :  { %3367 = vmatmul.mubr.msk.f32.gmra.mrb[2].mxu1 %vm4835_vm1, %v574_v18 }
 0x19c   :  { %3700 = vmatpush3.bf16.msra.mxu1 %v4307_v21 }
 0x19d   :  { %3702 = vmatprep.subr.bf16.mxu1 %v4317_v24 }
 0x26a   :  { %v3365_v29 = vpop.f32.mrb[0].mxu1 }
 0x26b   :  { %v3845_v32 = vadd.f32 %v3365_v29, %v2973_v28  ;;  %v659_v33 = vpop.f32.mrb[1].mxu1  ;;  %v3032_v29 = vld [vmem:[%s4820_s5 + $0xb0] sm:$0xff] }
 0x26c   :  { %v3846_v34 = vadd.f32 %v2973_v28, %v659_v33  ;;  %v4468_v37 = vpack.c.bf16 %v3033_v30, %v3032_v29  ;;  %v3056_v29 = vld [vmem:[%s4820_s5 + $0x100] sm:$0xff]  ;;  %v3057_v30 = vld [vmem:[%s4820_s5 + $0x108] sm:$0xff] }
 0x26d   :  { %685 = vst.msk [vmem:[#allocation2 + $0x10] sm:$0xff] %vm683_vm8, %v3845_v32 }
 0x26e   :  { %684 = vst.msk [vmem:[#allocation2 + $0x8] sm:$0xff] %vm683_vm8, %v3846_v34  ;;  %v3368_v36 = vpop.f32.mrb[2].mxu1  ;;  %3377 = vmatprep.mubr.msk.f32.mxu1 %vm683_vm8, %v3846_v34 }
 0x26f   :  { %v3847_v39 = vadd.f32 %v3368_v36, %v2973_v28  ;;  %v669_v40 = vpop.f32.mrb[3].mxu1  ;;  %3378 = vmatmul.mubr.msk.f32.vlgmr.msra.gmra.mrb[4].mxu1 %vm683_vm8, %v3845_v32 }
 0x270   :  { %v3848_v41 = vadd.f32 %v2973_v28, %v669_v40  ;;  %3704 = vmatpush3.bf16.msra.mxu1 %v4317_v24  ;;  %v4449_v28 = vpop.permute.xlu1 %1146 }
 0x271   :  { %687 = vst.msk [vmem:[#allocation2 + $0x20] sm:$0xff] %vm683_vm8, %v3847_v39  ;;  %3706 = vmatprep.subr.bf16.mxu1 %v4340_v35  ;;  %vm1151_vm9 = vcmp.eq.s32.totalorder %v4449_v28, 1 }
 0x272   :  { %686 = vst.msk [vmem:[#allocation2 + $0x18] sm:$0xff] %vm683_vm8, %v3848_v41  ;;  %3380 = vmatprep.mubr.msk.f32.mxu1 %vm683_vm8, %v3848_v41 }
 0x273   :  { %3381 = vmatmul.mubr.msk.f32.gmra.mrb[6].mxu1 %vm683_vm8, %v3847_v39 }
 0x274   :  { %3708 = vmatpush3.bf16.msra.mxu1 %v4340_v35  ;;  %v4471_v38 = vpop.permute.xlu1 %1272 }
 0x275   :  { %v796_v45 = vld [vmem:[#allocation2 + $0x7] sm:$0xff]  ;;  %v797_v46 = vld [vmem:[#allocation2 + $0xf] sm:$0xff]  ;;  %3710 = vmatprep.subr.bf16.mxu1 %v4354_v42  ;;  %vm1277_vm6 = vcmp.eq.s32.totalorder %v4471_v38, 1 }
 0x276   :  { %v800_v47 = vsel %vm443_vm11, %v796_v45, 0.0  ;;  %v801_v48 = vsel %vm444_vm15, %v797_v46, 0.0  ;;  %v909_v56 = vld [vmem:[#allocation2 + $0x9] sm:$0xff]  ;;  %v4481_v45 = vpop.permute.xlu0 %1275 }
 0x277   :  { %3391 = vmatprep.mubr.msk.f32.mxu1 %vm683_vm8, %v800_v47  ;;  %v913_v60 = vsel %vm569_vm0, %v909_v56, 0.0  ;;  %vm1278_vm12 = vcmp.eq.s32.totalorder %v4481_v45, 1  ;;  %v3039_v56 = vld [vmem:[%s4820_s5 + $0xe0] sm:$0xff] }
 0x278   :  { %3392 = vmatmul.mubr.msk.f32.vlgmr.msra.gmra.mrb[4].mxu1 %vm683_vm8, %v801_v48  ;;  %v912_v2 = vld [vmem:[#allocation2 + $0x21] sm:$0xff] }
 0x279   :  { %3712 = vmatpush3.bf16.msra.mxu1 %v4354_v42  ;;  %v798_v52 = vld [vmem:[#allocation2 + $0x17] sm:$0xff]  ;;  %v799_v54 = vld [vmem:[#allocation2 + $0x1f] sm:$0xff]  ;;  %v916_v4 = vsel %vm570_vm2, %v912_v2, 0.0 }
 0x27a   :  { %v802_v57 = vsel %vm443_vm11, %v798_v52, 0.0  ;;  %v803_v58 = vsel %vm444_vm15, %v799_v54, 0.0  ;;  %3714 = vmatprep.subr.bf16.mxu1 %v4371_v49  ;;  %v910_v61 = vld [vmem:[#allocation2 + $0x11] sm:$0xff]  ;;  %v911_v62 = vld [vmem:[#allocation2 + $0x19] sm:$0xff] }
 0x27b   :  { %3394 = vmatprep.mubr.msk.f32.mxu1 %vm683_vm8, %v802_v57  ;;  %v914_v63 = vsel %vm570_vm2, %v910_v61, 0.0  ;;  %v915_v1 = vsel %vm569_vm0, %v911_v62, 0.0  ;;  %v3040_v57 = vld [vmem:[%s4820_s5 + $0xe8] sm:$0xff]  ;;  %v3048_v61 = vld [vmem:[%s4820_s5 + $0xc0] sm:$0xff] }
 0x27c   :  { %3395 = vmatmul.mubr.msk.f32.gmra.mrb[6].mxu1 %vm683_vm8, %v803_v58  ;;  %v3042_v58 = vld [vmem:[%s4820_s5 + $0xf8] sm:$0xff]  ;;  %v3049_v62 = vld [vmem:[%s4820_s5 + $0xc8] sm:$0xff] }
 0x27d   :  { %3716 = vmatpush3.bf16.msra.mxu1 %v4371_v49  ;;  %3405 = vmatprep.mubr.msk.f32.mxu1 %vm683_vm8, %v913_v60 }
 0x27e   :  { %3718 = vmatprep.subr.bf16.mxu1 %v4387_v59 }
 0x280   :  { %3406 = vmatmul.mubr.msk.f32.vlgmr.msra.gmra.mrb[4].mxu1 %vm683_vm8, %v914_v63  ;;  %v4530_v63 = vpack.c.bf16 %v3049_v62, %v3048_v61 }
 0x281   :  { %3408 = vmatprep.mubr.msk.f32.mxu1 %vm683_vm8, %v915_v1  ;;  %3720 = vmatpush3.bf16.msra.mxu1 %v4387_v59 }
 0x282   :  { %3722 = vmatprep.subr.bf16.mxu1 %v4412_v8 }
 0x284   :  { %3409 = vmatmul.mubr.msk.f32.gmra.mrb[6].mxu1 %vm683_vm8, %v916_v4 }
 0x285   :  { %3724 = vmatpush3.bf16.msra.mxu1 %v4412_v8 }
 0x353   :  { %v3407_v17 = vpop.f32.mrb[4].mxu1 }
 0x354   :  { %v3849_v18 = vadd.f32 %v3407_v17, %v4438_v16  ;;  %v1000_v19 = vpop.f32.mrb[5].mxu1  ;;  %v3051_v17 = vld [vmem:[%s4820_s5 + $0xd8] sm:$0xff] }
 0x355   :  { %v3850_v20 = vadd.f32 %v4438_v16, %v1000_v19 }
 0x356   :  { %1026 = vst.msk [vmem:[#allocation2 + $0x10] sm:$0xff] %vm683_vm8, %v3849_v18 }
 0x357   :  { %1025 = vst.msk [vmem:[#allocation2 + $0x8] sm:$0xff] %vm683_vm8, %v3850_v20  ;;  %v3410_v22 = vpop.f32.mrb[6].mxu1  ;;  %3419 = vmatprep.mubr.msk.f32.mxu1 %vm683_vm8, %v3850_v20 }
 0x358   :  { %v3851_v23 = vadd.f32 %v3410_v22, %v4438_v16  ;;  %v1010_v25 = vpop.f32.mrb[7].mxu1  ;;  %3420 = vmatmul.mubr.msk.f32.vlgmr.msra.gmra.mrb[8].mxu1 %vm683_vm8, %v3849_v18 }
 0x359   :  { %v3852_v26 = vadd.f32 %v4438_v16, %v1010_v25 }
 0x35a   :  { %1028 = vst.msk [vmem:[#allocation2 + $0x20] sm:$0xff] %vm683_vm8, %v3851_v23 }
 0x35b   :  { %1027 = vst.msk [vmem:[#allocation2 + $0x18] sm:$0xff] %vm683_vm8, %v3852_v26  ;;  %3422 = vmatprep.mubr.msk.f32.mxu1 %vm683_vm8, %v3852_v26 }
 0x35c   :  { %3423 = vmatmul.mubr.msk.f32.gmra.mrb[10].mxu1 %vm683_vm8, %v3851_v23  ;;  %v4548_v23 = vpack.c.bf16 %v3051_v17, %v3050_v15 }
 0x35e   :  { %v1137_v32 = vld [vmem:[#allocation2 + $0x6] sm:$0xff]  ;;  %v1138_v33 = vld [vmem:[#allocation2 + $0xe] sm:$0xff] }
 0x35f   :  { %v1153_v34 = vsel %vm1151_vm9, %v1137_v32, 0.0  ;;  %v1154_v36 = vsel %vm1152_vm5, %v1138_v33, 0.0  ;;  %v1263_v41 = vld [vmem:[#allocation2 + $0xa] sm:$0xff] }
 0x360   :  { %3433 = vmatprep.mubr.msk.f32.mxu0 %vm683_vm8, %v1153_v34  ;;  %v1279_v46 = vsel %vm1277_vm6, %v1263_v41, 0.0 }
 0x361   :  { %3434 = vmatmul.mubr.msk.f32.vlgmr.msra.gmra.mrb[8].mxu0 %vm683_vm8, %v1154_v36  ;;  %v1266_v52 = vld [vmem:[#allocation2 + $0x22] sm:$0xff]  ;;  %v4563_v36 = vpack.c.bf16 %v3057_v30, %v3056_v29 }
 0x362   :  { %3736 = vmatpush3.bf16.msra.mxu0 %v4432_v0  ;;  %v1139_v39 = vld [vmem:[#allocation2 + $0x16] sm:$0xff]  ;;  %v1140_v40 = vld [vmem:[#allocation2 + $0x1e] sm:$0xff]  ;;  %v1282_v54 = vsel %vm1278_vm12, %v1266_v52, 0.0 }
 0x363   :  { %v1155_v43 = vsel %vm1151_vm9, %v1139_v39, 0.0  ;;  %v1156_v44 = vsel %vm1152_vm5, %v1140_v40, 0.0  ;;  %3738 = vmatprep.subr.bf16.mxu0 %v4468_v37  ;;  %v1264_v47 = vld [vmem:[#allocation2 + $0x12] sm:$0xff]  ;;  %v1265_v48 = vld [vmem:[#allocation2 + $0x1a] sm:$0xff] }
 0x364   :  { %3436 = vmatprep.mubr.msk.f32.mxu0 %vm683_vm8, %v1155_v43  ;;  %v1280_v50 = vsel %vm1278_vm12, %v1264_v47, 0.0  ;;  %v1281_v51 = vsel %vm1277_vm6, %v1265_v48, 0.0  ;;  %v3058_v39 = vld [vmem:[%s4820_s5 + $0x110] sm:$0xff]  ;;  %v3059_v40 = vld [vmem:[%s4820_s5 + $0x118] sm:$0xff] }
 0x365   :  { %3437 = vmatmul.mubr.msk.f32.gmra.mrb[10].mxu0 %vm683_vm8, %v1156_v44  ;;  %v4580_v47 = vpack.c.bf16 %v3059_v40, %v3058_v39 }
 0x366   :  { %3740 = vmatpush3.bf16.msra.mxu0 %v4468_v37  ;;  %3447 = vmatprep.mubr.msk.f32.mxu0 %vm683_vm8, %v1279_v46 }
 0x367   :  { %3766 = vmatprep.subr.bf16.mxu0 %v4287_v14 }
 0x369   :  { %3448 = vmatmul.mubr.msk.f32.vlgmr.msra.gmra.mrb[8].mxu0 %vm683_vm8, %v1280_v50 }
 0x36a   :  { %3450 = vmatprep.mubr.msk.f32.mxu0 %vm683_vm8, %v1281_v51  ;;  %3768 = vmatpush3.bf16.msra.mxu0 %v4287_v14  ;;  %v4510_v14 = vpack.c.bf16 %v3040_v57, %v3039_v56 }
 0x36b   :  { %3770 = vmatprep.subr.bf16.mxu0 %v4307_v21 }
 0x36c   :  { %3742 = vmatprep.subr.bf16.mxu1 %v4510_v14 }
 0x36d   :  { %3451 = vmatmul.mubr.msk.f32.gmra.mrb[10].mxu0 %vm683_vm8, %v1282_v54  ;;  %3744 = vmatpush3.bf16.msra.mxu1 %v4510_v14 }
 0x36e   :  { %3772 = vmatpush3.bf16.msra.mxu0 %v4307_v21  ;;  %v3041_v21 = vld [vmem:[%s4820_s5 + $0xf0] sm:$0xff] }
 0x36f   :  { %3774 = vmatprep.subr.bf16.mxu0 %v4317_v24  ;;  %v4520_v60 = vpack.c.bf16 %v3042_v58, %v3041_v21 }
 0x371   :  { %3746 = vmatprep.subr.bf16.mxu1 %v4520_v60 }
 0x372   :  { %3748 = vmatpush3.bf16.msra.mxu1 %v4520_v60 }
 0x373   :  { %3750 = vmatprep.subr.bf16.mxu1 %v4530_v63 }
 0x42b   :  { %v3421_v1 = vpop.f32.mrb[8].mxu1 }
 0x42c   :  { %v1118_v2 = vpop.f32.mrb[9].mxu1  ;;  %v1124_v9 = vadd.f32 %v3421_v1, %v4536_v6 }
 0x42d   :  { %v1119_v10 = vadd.f32 %v4536_v6, %v1118_v2  ;;  %v4613_v2 = vld [vmem:[%s4822_s6 + $0x2] ss:$0 sm:$0xff] }
 0x42f   :  { %v3424_v4 = vpop.f32.mrb[10].mxu1 }
 0x430   :  { %v1128_v5 = vpop.f32.mrb[11].mxu1  ;;  %v1134_v22 = vadd.f32 %v3424_v4, %v4536_v6 }
 0x431   :  { %v1129_v25 = vadd.f32 %v4536_v6, %v1128_v5 }
 0x43c   :  { %v3449_v13 = vpop.f32.mrb[8].mxu0 }
 0x43d   :  { %v3854_v18 = vadd.f32 %v3449_v13, %v1124_v9  ;;  %v1366_v19 = vpop.f32.mrb[9].mxu0 }
 0x43e   :  { %v3856_v20 = vadd.f32 %v1366_v19, %v1119_v10 }
 0x43f   :  { %1392 = vst.msk [vmem:[#allocation2 + $0x10] sm:$0xff] %vm683_vm8, %v3854_v18 }
 0x440   :  { %1391 = vst.msk [vmem:[#allocation2 + $0x8] sm:$0xff] %vm683_vm8, %v3856_v20  ;;  %v3452_v26 = vpop.f32.mrb[10].mxu0  ;;  %3461 = vmatprep.mubr.msk.f32.mxu1 %vm683_vm8, %v3856_v20 }
 0x441   :  { %v3858_v32 = vadd.f32 %v3452_v26, %v1134_v22  ;;  %v1376_v33 = vpop.f32.mrb[11].mxu0  ;;  %3462 = vmatmul.mubr.msk.f32.vlgmr.msra.gmra.mrb[12].mxu1 %vm683_vm8, %v3854_v18 }
 0x442   :  { %v3860_v34 = vadd.f32 %v1376_v33, %v1129_v25  ;;  %3752 = vmatpush3.bf16.msra.mxu1 %v4530_v63 }
 0x443   :  { %1394 = vst.msk [vmem:[#allocation2 + $0x20] sm:$0xff] %vm683_vm8, %v3858_v32  ;;  %3754 = vmatprep.subr.bf16.mxu1 %v4548_v23 }
 0x444   :  { %1393 = vst.msk [vmem:[#allocation2 + $0x18] sm:$0xff] %vm683_vm8, %v3860_v34  ;;  %3464 = vmatprep.mubr.msk.f32.mxu1 %vm683_vm8, %v3860_v34 }
 0x445   :  { %3465 = vmatmul.mubr.msk.f32.gmra.mrb[14].mxu1 %vm683_vm8, %v3858_v32 }
 0x446   :  { %3756 = vmatpush3.bf16.msra.mxu1 %v4548_v23 }
 0x447   :  { %v1503_v41 = vld [vmem:[#allocation2 + $0x7] sm:$0xff]  ;;  %v1504_v43 = vld [vmem:[#allocation2 + $0xf] sm:$0xff]  ;;  %3758 = vmatprep.subr.bf16.mxu1 %v4563_v36 }
 0x448   :  { %v1507_v44 = vsel %vm443_vm11, %v1503_v41, 0.0  ;;  %v1508_v46 = vsel %vm444_vm15, %v1504_v43, 0.0  ;;  %v1617_v51 = vld [vmem:[#allocation2 + $0x9] sm:$0xff] }
 0x449   :  { %3475 = vmatprep.mubr.msk.f32.mxu1 %vm683_vm8, %v1507_v44  ;;  %v1621_v56 = vsel %vm569_vm0, %v1617_v51, 0.0 }
 0x44a   :  { %3476 = vmatmul.mubr.msk.f32.vlgmr.msra.gmra.mrb[12].mxu1 %vm683_vm8, %v1508_v46  ;;  %v1620_v62 = vld [vmem:[#allocation2 + $0x21] sm:$0xff] }
 0x44b   :  { %3760 = vmatpush3.bf16.msra.mxu1 %v4563_v36  ;;  %v1505_v48 = vld [vmem:[#allocation2 + $0x17] sm:$0xff]  ;;  %v1506_v50 = vld [vmem:[#allocation2 + $0x1f] sm:$0xff]  ;;  %v1624_v1 = vsel %vm570_vm2, %v1620_v62, 0.0  ;;  %v2746_v62 = vld [vmem:[%s4823_s7 + $0x8] sm:$0xff] }
 0x44c   :  { %v1509_v52 = vsel %vm443_vm11, %v1505_v48, 0.0  ;;  %v1510_v54 = vsel %vm444_vm15, %v1506_v50, 0.0  ;;  %3762 = vmatprep.subr.bf16.mxu1 %v4580_v47  ;;  %v1618_v57 = vld [vmem:[#allocation2 + $0x11] sm:$0xff]  ;;  %v1619_v21 = vld [vmem:[#allocation2 + $0x19] sm:$0xff] }
 0x44d   :  { %3478 = vmatprep.mubr.msk.f32.mxu1 %vm683_vm8, %v1509_v52  ;;  %v1622_v58 = vsel %vm570_vm2, %v1618_v57, 0.0  ;;  %v1623_v61 = vsel %vm569_vm0, %v1619_v21, 0.0 }
 0x44e   :  { %3479 = vmatmul.mubr.msk.f32.gmra.mrb[14].mxu1 %vm683_vm8, %v1510_v54 }
 0x44f   :  { %3764 = vmatpush3.bf16.msra.mxu1 %v4580_v47  ;;  %3489 = vmatprep.mubr.msk.f32.mxu1 %vm683_vm8, %v1621_v56 }
 0x450   :  { %3790 = vmatprep.subr.bf16.mxu1 %v4387_v59 }
 0x452   :  { %3490 = vmatmul.mubr.msk.f32.vlgmr.msra.gmra.mrb[12].mxu1 %vm683_vm8, %v1622_v58 }
 0x453   :  { %3492 = vmatprep.mubr.msk.f32.mxu1 %vm683_vm8, %v1623_v61  ;;  %3792 = vmatpush3.bf16.msra.mxu1 %v4387_v59 }
 0x454   :  { %3794 = vmatprep.subr.bf16.mxu1 %v4412_v8 }
 0x456   :  { %3493 = vmatmul.mubr.msk.f32.gmra.mrb[14].mxu1 %vm683_vm8, %v1624_v1 }
 0x457   :  { %3796 = vmatpush3.bf16.msra.mxu1 %v4412_v8 }
 0x458   :  { %3798 = vmatprep.subr.bf16.mxu1 %v4326_v27 }
 0x525   :  { %v3491_v4 = vpop.f32.mrb[12].mxu1 }
 0x526   :  { %v3861_v5 = vadd.f32 %v3491_v4, %v4613_v2  ;;  %v1708_v59 = vpop.f32.mrb[13].mxu1 }
 0x527   :  { %v3862_v9 = vadd.f32 %v4613_v2, %v1708_v59 }
 0x528   :  { %1733 = vst.msk [vmem:[#allocation2 + $0x10] sm:$0xff] %vm683_vm8, %v3861_v5 }
 0x529   :  { %1732 = vst.msk [vmem:[#allocation2 + $0x8] sm:$0xff] %vm683_vm8, %v3862_v9  ;;  %v3494_v10 = vpop.f32.mrb[14].mxu1  ;;  %3503 = vmatprep.mubr.msk.f32.mxu0 %vm683_vm8, %v3862_v9 }
 0x52a   :  { %v3863_v8 = vadd.f32 %v3494_v10, %v4613_v2  ;;  %v1718_v13 = vpop.f32.mrb[15].mxu1  ;;  %3504 = vmatmul.mubr.msk.f32.vlgmr.msra.gmra.mrb[12].mxu0 %vm683_vm8, %v3861_v5 }
 0x52b   :  { %v3864_v15 = vadd.f32 %v4613_v2, %v1718_v13  ;;  %3776 = vmatpush3.bf16.msra.mxu0 %v4317_v24 }
 0x52c   :  { %1735 = vst.msk [vmem:[#allocation2 + $0x20] sm:$0xff] %vm683_vm8, %v3863_v8  ;;  %3778 = vmatprep.subr.bf16.mxu0 %v4340_v35 }
 0x52d   :  { %1734 = vst.msk [vmem:[#allocation2 + $0x18] sm:$0xff] %vm683_vm8, %v3864_v15  ;;  %3506 = vmatprep.mubr.msk.f32.mxu0 %vm683_vm8, %v3864_v15 }
 0x52e   :  { %3507 = vmatmul.mubr.msk.f32.gmra.mrb[14].mxu0 %vm683_vm8, %v3863_v8 }
 0x52f   :  { %3780 = vmatpush3.bf16.msra.mxu0 %v4340_v35 }
 0x530   :  { %v1843_v17 = vld [vmem:[#allocation2 + $0x7] sm:$0xff]  ;;  %v1844_v18 = vld [vmem:[#allocation2 + $0xf] sm:$0xff]  ;;  %3782 = vmatprep.subr.bf16.mxu0 %v4354_v42 }
 0x531   :  { %v1847_v19 = vsel %vm443_vm11, %v1843_v17, 0.0  ;;  %v1848_v24 = vsel %vm444_vm15, %v1844_v18, 0.0  ;;  %v1956_v25 = vld [vmem:[#allocation2 + $0x9] sm:$0xff] }
 0x532   :  { %3517 = vmatprep.mubr.msk.f32.mxu0 %vm683_vm8, %v1847_v19  ;;  %v1960_v29 = vsel %vm569_vm0, %v1956_v25, 0.0 }
 0x533   :  { %3518 = vmatmul.mubr.msk.f32.vlgmr.msra.gmra.mrb[12].mxu0 %vm683_vm8, %v1848_v24  ;;  %v1959_v34 = vld [vmem:[#allocation2 + $0x21] sm:$0xff] }
 0x534   :  { %3784 = vmatpush3.bf16.msra.mxu0 %v4354_v42  ;;  %v1845_v20 = vld [vmem:[#allocation2 + $0x17] sm:$0xff]  ;;  %v1846_v22 = vld [vmem:[#allocation2 + $0x1f] sm:$0xff] }
 0x535   :  { %v1849_v35 = vsel %vm443_vm11, %v1845_v20, 0.0  ;;  %v1850_v26 = vsel %vm444_vm15, %v1846_v22, 0.0  ;;  %3786 = vmatprep.subr.bf16.mxu0 %v4371_v49  ;;  %v1957_v30 = vld [vmem:[#allocation2 + $0x11] sm:$0xff]  ;;  %v1958_v42 = vld [vmem:[#allocation2 + $0x19] sm:$0xff] }
 0x536   :  { %3520 = vmatprep.mubr.msk.f32.mxu0 %vm683_vm8, %v1849_v35  ;;  %v1961_v32 = vsel %vm570_vm2, %v1957_v30, 0.0  ;;  %v1962_v33 = vsel %vm569_vm0, %v1958_v42, 0.0 }
 0x537   :  { %3521 = vmatmul.mubr.msk.f32.gmra.mrb[14].mxu0 %vm683_vm8, %v1850_v26  ;;  %v2748_v26 = vld [vmem:[%s4823_s7 + $0x18] sm:$0xff] }
 0x538   :  { %3788 = vmatpush3.bf16.msra.mxu0 %v4371_v49  ;;  %3531 = vmatprep.mubr.msk.f32.mxu0 %vm683_vm8, %v1960_v29  ;;  %v1963_v49 = vsel %vm570_vm2, %v1959_v34, 0.0 }
 0x539   :  { %3814 = vmatprep.subr.bf16.mxu0 %v4510_v14 }
 0x53b   :  { %3532 = vmatmul.mubr.msk.f32.vlgmr.msra.gmra.mrb[12].mxu0 %vm683_vm8, %v1961_v32 }
 0x53c   :  { %3534 = vmatprep.mubr.msk.f32.mxu0 %vm683_vm8, %v1962_v33  ;;  %3816 = vmatpush3.bf16.msra.mxu0 %v4510_v14 }
 0x53d   :  { %3818 = vmatprep.subr.bf16.mxu0 %v4520_v60 }
 0x53f   :  { %3535 = vmatmul.mubr.msk.f32.gmra.mrb[14].mxu0 %vm683_vm8, %v1963_v49 }
 0x540   :  { %3820 = vmatpush3.bf16.msra.mxu0 %v4520_v60 }
 0x541   :  { %3822 = vmatprep.subr.bf16.mxu0 %v4530_v63 }
 0x60e   :  { %v3533_v39 = vpop.f32.mrb[12].mxu0 }
 0x60f   :  { %v3865_v40 = vadd.f32 %v3533_v39, %v4438_v16  ;;  %v2046_v41 = vpop.f32.mrb[13].mxu0  ;;  %v3137_v39 = vld [vmem:[%s4824_s8] ss:$0 sm:$0xff] }
 0x610   :  { %v3866_v43 = vadd.f32 %v4438_v16, %v2046_v41 }
 0x611   :  { %2071 = vst.msk [vmem:[#allocation2 + $0x10] sm:$0xff] %vm683_vm8, %v3865_v40 }
 0x612   :  { %2070 = vst.msk [vmem:[#allocation2 + $0x8] sm:$0xff] %vm683_vm8, %v3866_v43  ;;  %v3536_v14 = vpop.f32.mrb[14].mxu0  ;;  %3545 = vmatprep.mubr.msk.f32.mxu1 %vm683_vm8, %v3866_v43 }
 0x613   :  { %v3867_v44 = vadd.f32 %v3536_v14, %v4438_v16  ;;  %v2056_v46 = vpop.f32.mrb[15].mxu0  ;;  %3546 = vmatmul.mubr.msk.f32.vlgmr.msra.gmra.mrb[16].mxu1 %vm683_vm8, %v3865_v40 }
 0x614   :  { %v3868_v60 = vadd.f32 %v4438_v16, %v2056_v46  ;;  %3800 = vmatpush3.bf16.msra.mxu1 %v4326_v27 }
 0x615   :  { %2073 = vst.msk [vmem:[#allocation2 + $0x20] sm:$0xff] %vm683_vm8, %v3867_v44  ;;  %3802 = vmatprep.subr.bf16.mxu1 %v4422_v12 }
 0x616   :  { %2072 = vst.msk [vmem:[#allocation2 + $0x18] sm:$0xff] %vm683_vm8, %v3868_v60  ;;  %3548 = vmatprep.mubr.msk.f32.mxu1 %vm683_vm8, %v3868_v60 }
 0x617   :  { %3549 = vmatmul.mubr.msk.f32.gmra.mrb[18].mxu1 %vm683_vm8, %v3867_v44 }
 0x618   :  { %3804 = vmatpush3.bf16.msra.mxu1 %v4422_v12 }
 0x619   :  { %v2181_v48 = vld [vmem:[#allocation2 + $0x6] sm:$0xff]  ;;  %v2182_v50 = vld [vmem:[#allocation2 + $0xe] sm:$0xff]  ;;  %3806 = vmatprep.subr.bf16.mxu1 %v4432_v0 }
 0x61a   :  { %v2185_v16 = vsel %vm1151_vm9, %v2181_v48, 0.0  ;;  %v2186_v27 = vsel %vm1152_vm5, %v2182_v50, 0.0  ;;  %v2294_v54 = vld [vmem:[#allocation2 + $0xa] sm:$0xff] }
 0x61b   :  { %3559 = vmatprep.mubr.msk.f32.mxu1 %vm683_vm8, %v2185_v16  ;;  %v2298_v57 = vsel %vm1277_vm6, %v2294_v54, 0.0 }
 0x61c   :  { %3560 = vmatmul.mubr.msk.f32.vlgmr.msra.gmra.mrb[16].mxu1 %vm683_vm8, %v2186_v27  ;;  %v2297_v58 = vld [vmem:[#allocation2 + $0x22] sm:$0xff] }
 0x61d   :  { %3808 = vmatpush3.bf16.msra.mxu1 %v4432_v0  ;;  %v2183_v51 = vld [vmem:[#allocation2 + $0x16] sm:$0xff]  ;;  %v2184_v52 = vld [vmem:[#allocation2 + $0x1e] sm:$0xff]  ;;  %v2301_v61 = vsel %vm1278_vm12, %v2297_v58, 0.0 }
 0x61e   :  { %v2187_v12 = vsel %vm1151_vm9, %v2183_v51, 0.0  ;;  %v2188_v56 = vsel %vm1152_vm5, %v2184_v52, 0.0  ;;  %3810 = vmatprep.subr.bf16.mxu1 %v4468_v37  ;;  %v2295_v21 = vld [vmem:[#allocation2 + $0x12] sm:$0xff]  ;;  %v2296_v0 = vld [vmem:[#allocation2 + $0x1a] sm:$0xff] }
 0x61f   :  { %3562 = vmatprep.mubr.msk.f32.mxu1 %vm683_vm8, %v2187_v12  ;;  %v2299_v28 = vsel %vm1278_vm12, %v2295_v21, 0.0  ;;  %v2300_v31 = vsel %vm1277_vm6, %v2296_v0, 0.0 }
 0x620   :  { %3563 = vmatmul.mubr.msk.f32.gmra.mrb[18].mxu1 %vm683_vm8, %v2188_v56 }
 0x621   :  { %3812 = vmatpush3.bf16.msra.mxu1 %v4468_v37  ;;  %3573 = vmatprep.mubr.msk.f32.mxu1 %vm683_vm8, %v2298_v57  ;;  %v2745_v37 = vld [vmem:[%s4823_s7] sm:$0xff] }
 0x622   :  { %v3837_v1 = vpack.c.bf16 %v2746_v62, %v2745_v37 }
 0x624   :  { %3574 = vmatmul.mubr.msk.f32.vlgmr.msra.gmra.mrb[16].mxu1 %vm683_vm8, %v2299_v28  ;;  %3838 = vmatprep.subr.bf16.mxu1 %v3837_v1 }
 0x625   :  { %3576 = vmatprep.mubr.msk.f32.mxu1 %vm683_vm8, %v2300_v31  ;;  %3840 = vmatpush3.bf16.msra.mxu1 %v3837_v1 }
 0x628   :  { %3577 = vmatmul.mubr.msk.f32.gmra.mrb[18].mxu1 %vm683_vm8, %v2301_v61 }
 0x6f7   :  { %v3575_v38 = vpop.f32.mrb[16].mxu1 }
 0x6f8   :  { %v3869_v4 = vadd.f32 %v3575_v38, %v4536_v6  ;;  %v2384_v5 = vpop.f32.mrb[17].mxu1 }
 0x6f9   :  { %v3870_v45 = vadd.f32 %v4536_v6, %v2384_v5 }
 0x6fa   :  { %2409 = vst.msk [vmem:[#allocation2 + $0x10] sm:$0xff] %vm683_vm8, %v3869_v4 }
 0x6fb   :  { %2408 = vst.msk [vmem:[#allocation2 + $0x8] sm:$0xff] %vm683_vm8, %v3870_v45  ;;  %v3578_v59 = vpop.f32.mrb[18].mxu1  ;;  %3587 = vmatprep.mubr.msk.f32.mxu0 %vm683_vm8, %v3870_v45 }
 0x6fc   :  { %v3871_v9 = vadd.f32 %v3578_v59, %v4536_v6  ;;  %v2394_v10 = vpop.f32.mrb[19].mxu1  ;;  %3588 = vmatmul.mubr.msk.f32.vlgmr.msra.gmra.mrb[16].mxu0 %vm683_vm8, %v3869_v4 }
 0x6fd   :  { %v3872_v8 = vadd.f32 %v4536_v6, %v2394_v10  ;;  %3824 = vmatpush3.bf16.msra.mxu0 %v4530_v63 }
 0x6fe   :  { %2411 = vst.msk [vmem:[#allocation2 + $0x20] sm:$0xff] %vm683_vm8, %v3871_v9  ;;  %3826 = vmatprep.subr.bf16.mxu0 %v4548_v23 }
 0x6ff   :  { %2410 = vst.msk [vmem:[#allocation2 + $0x18] sm:$0xff] %vm683_vm8, %v3872_v8  ;;  %3590 = vmatprep.mubr.msk.f32.mxu0 %vm683_vm8, %v3872_v8 }
 0x700   :  { %3591 = vmatmul.mubr.msk.f32.gmra.mrb[18].mxu0 %vm683_vm8, %v3871_v9 }
 0x701   :  { %3828 = vmatpush3.bf16.msra.mxu0 %v4548_v23 }
 0x702   :  { %v2519_v13 = vld [vmem:[#allocation2 + $0x7] sm:$0xff]  ;;  %v2520_v15 = vld [vmem:[#allocation2 + $0xf] sm:$0xff]  ;;  %3830 = vmatprep.subr.bf16.mxu0 %v4563_v36 }
 0x703   :  { %v2523_v6 = vsel %vm443_vm11, %v2519_v13, 0.0  ;;  %v2524_v63 = vsel %vm444_vm15, %v2520_v15, 0.0  ;;  %v2632_v19 = vld [vmem:[#allocation2 + $0x9] sm:$0xff] }
 0x704   :  { %3601 = vmatprep.mubr.msk.f32.mxu0 %vm683_vm8, %v2523_v6  ;;  %v2636_v20 = vsel %vm569_vm0, %v2632_v19, 0.0 }
 0x705   :  { %3602 = vmatmul.mubr.msk.f32.vlgmr.msra.gmra.mrb[16].mxu0 %vm683_vm8, %v2524_v63  ;;  %v2635_v25 = vld [vmem:[#allocation2 + $0x21] sm:$0xff] }
 0x706   :  { %3832 = vmatpush3.bf16.msra.mxu0 %v4563_v36  ;;  %v2521_v17 = vld [vmem:[#allocation2 + $0x17] sm:$0xff]  ;;  %v2522_v18 = vld [vmem:[#allocation2 + $0x1f] sm:$0xff]  ;;  %v2639_v35 = vsel %vm570_vm2, %v2635_v25, 0.0 }
 0x707   :  { %v2525_v23 = vsel %vm443_vm11, %v2521_v17, 0.0  ;;  %v2526_v24 = vsel %vm444_vm15, %v2522_v18, 0.0  ;;  %3834 = vmatprep.subr.bf16.mxu0 %v4580_v47  ;;  %v2633_v22 = vld [vmem:[#allocation2 + $0x11] sm:$0xff]  ;;  %v2634_v36 = vld [vmem:[#allocation2 + $0x19] sm:$0xff]  ;;  %vm2853_vm11 = vcmask 64512  }
 0x708   :  { %3604 = vmatprep.mubr.msk.f32.mxu0 %vm683_vm8, %v2525_v23  ;;  %v2637_v53 = vsel %vm570_vm2, %v2633_v22, 0.0  ;;  %v2638_v55 = vsel %vm569_vm0, %v2634_v36, 0.0 }
 0x709   :  { %3605 = vmatmul.mubr.msk.f32.gmra.mrb[18].mxu0 %vm683_vm8, %v2526_v24 }
 0x70a   :  { %3836 = vmatpush3.bf16.msra.mxu0 %v4580_v47  ;;  %3615 = vmatprep.mubr.msk.f32.mxu0 %vm683_vm8, %v2636_v20  ;;  %v2747_v47 = vld [vmem:[%s4823_s7 + $0x10] sm:$0xff] }
 0x70b   :  { %v3841_v29 = vpack.c.bf16 %v2748_v26, %v2747_v47 }
 0x70d   :  { %3616 = vmatmul.mubr.msk.f32.vlgmr.msra.gmra.mrb[16].mxu0 %vm683_vm8, %v2637_v53  ;;  %3842 = vmatprep.subr.bf16.mxu1 %v3841_v29 }
 0x70e   :  { %3618 = vmatprep.mubr.msk.f32.mxu0 %vm683_vm8, %v2638_v55  ;;  %3844 = vmatpush3.bf16.msra.mxu1 %v3841_v29 }
 0x711   :  { %3619 = vmatmul.mubr.msk.f32.gmra.mrb[18].mxu0 %vm683_vm8, %v2639_v35 }
 0x7e0   :  { %v3617_v3 = vpop.f32.mrb[16].mxu0 }
 0x7e1   :  { %v2722_v30 = vpop.f32.mrb[17].mxu0  ;;  %v3873_v7 = vadd.f32 %v3617_v3, %v4613_v2 }
 0x7e2   :  { %v3874_v42 = vadd.f32 %v4613_v2, %v2722_v30 }
 0x7e4   :  { %v3620_v32 = vpop.f32.mrb[18].mxu0  ;;  %3629 = vmatprep.mubr.msk.f32.mxu1 %vm683_vm8, %v3874_v42 }
 0x7e5   :  { %v2732_v33 = vpop.f32.mrb[19].mxu0  ;;  %3630 = vmatmul.mubr.msk.f32.vlgmr.msra.gmra.mrb[20].mxu1 %vm683_vm8, %v3873_v7  ;;  %v3875_v49 = vadd.f32 %v3620_v32, %v4613_v2 }
 0x7e6   :  { %v3876_v34 = vadd.f32 %v4613_v2, %v2732_v33 }
 0x7e8   :  { %3632 = vmatprep.mubr.msk.f32.mxu1 %vm683_vm8, %v3876_v34 }
 0x7e9   :  { %3633 = vmatmul.mubr.msk.f32.gmra.mrb[22].mxu1 %vm683_vm8, %v3875_v49 }
 0x8b8   :  { %v3631_v40 = vpop.f32.mrb[20].mxu1 }
 0x8b9   :  { %v2840_v41 = vadd.f32 %v3631_v40, %v3137_v39  ;;  %v2834_v43 = vpop.f32.mrb[21].mxu1 }
 0x8ba   :  { %v2835_v14 = vadd.f32 %v3137_v39, %v2834_v43 }
 0x8bb   :  { %2855 = vst.msk [vmem:[%s4825_s9 + $0x8] sm:$0xff] %vm2853_vm11, %v2840_v41  ;;  %v2861_v2 = vsel %vm2853_vm11, %v2840_v41, -inf }
 0x8bc   :  { %2854 = vst.msk [vmem:[%s4825_s9] sm:$0xff] %vm2853_vm11, %v2835_v14  ;;  %2862 = vmax.xlane.f32.xlu0 %v2861_v2  ;;  %v3634_v44 = vpop.f32.mrb[22].mxu1  ;;  %v2858_v46 = vsel %vm2853_vm11, %v2835_v14, -inf }
 0x8bd   :  { %v2850_v60 = vadd.f32 %v3634_v44, %v3137_v39  ;;  %2859 = vmax.xlane.f32.xlu1 %v2858_v46  ;;  %v2844_v48 = vpop.f32.mrb[23].mxu1 }
 0x8be   :  { %v2845_v50 = vadd.f32 %v3137_v39, %v2844_v48 }
 0x8bf   :  { %2857 = vst.msk [vmem:[%s4825_s9 + $0x18] sm:$0xff] %vm2853_vm11, %v2850_v60  ;;  %v2867_v16 = vsel %vm2853_vm11, %v2850_v60, -inf }
 0x8c0   :  { %2856 = vst.msk [vmem:[%s4825_s9 + $0x10] sm:$0xff] %vm2853_vm11, %v2845_v50  ;;  %v2864_v27 = vsel %vm2853_vm11, %v2845_v50, -inf }
 0x8c1   :  { %2868 = vmax.xlane.f32.xlu1 %v2867_v16  ;;  %2865 = vmax.xlane.f32.xlu0 %v2864_v27 }
 0x949   :  { %v2863_v51 = vpop.xlane.xlu0 %2862 }
 0x94a   :  { %vm2871_vm15 = vcmp.ge.f32.partialorder %v2840_v41, %v2863_v51  ;;  %v2860_v52 = vpop.xlane.xlu1 %2859 }
 0x94b   :  { %v2875_v54 = vsel %vm2871_vm15, %v4151_v11, 8  ;;  %vm2870_vm13 = vcmp.ge.f32.partialorder %v2835_v14, %v2860_v52 }
 0x94c   :  { %v2893_v12 = vsel %vm2853_vm11, %v2875_v54, 2147483647  ;;  %v2874_v56 = vsel %vm2870_vm13, %v4151_v11, 8 }
 0x94d   :  { %v2878_v57 = vsel %vm2853_vm11, %v2874_v56, 2147483647  ;;  %v2895_v21 = vshra.s32 %v2893_v12, 16  ;;  %v2894_v9 = vand.u32 65535, %v2893_v12 }
 0x94e   :  { %v2869_v0 = vpop.xlane.xlu1 %2868  ;;  %v2866_v28 = vpop.xlane.xlu0 %2865  ;;  %v2880_v31 = vshra.s32 %v2878_v57, 16  ;;  %v2879_v10 = vand.u32 65535, %v2878_v57 }
 0x94f   :  { %vm2873_vm14 = vcmp.ge.f32.partialorder %v2850_v60, %v2869_v0  ;;  %vm2872_vm0 = vcmp.ge.f32.partialorder %v2845_v50, %v2866_v28  ;;  %v2897_v58 = vcvt.s32.f32 %v2895_v21  ;;  %v2896_v13 = vcvt.s32.f32 %v2894_v9 }
 0x950   :  { %v2877_v61 = vsel %vm2873_vm14, %v4151_v11, 8  ;;  %v2876_v37 = vsel %vm2872_vm0, %v4151_v11, 8  ;;  %v2882_v62 = vcvt.s32.f32 %v2880_v31  ;;  %v2881_v11 = vcvt.s32.f32 %v2879_v10 }
 0x951   :  { %v2923_v1 = vsel %vm2853_vm11, %v2877_v61, 2147483647  ;;  %v2908_v38 = vsel %vm2853_vm11, %v2876_v37, 2147483647  ;;  %2898 = vmin.xlane.f32.xlu1 %v2897_v58 }
 0x952   :  { %2883 = vmin.xlane.f32.xlu0 %v2882_v62  ;;  %v2925_v4 = vshra.s32 %v2923_v1, 16  ;;  %v2910_v5 = vshra.s32 %v2908_v38, 16  ;;  %v2924_v6 = vand.u32 65535, %v2923_v1  ;;  %v2909_v63 = vand.u32 65535, %v2908_v38 }
 0x954   :  { %v2927_v45 = vcvt.s32.f32 %v2925_v4  ;;  %v2912_v59 = vcvt.s32.f32 %v2910_v5  ;;  %v2926_v24 = vcvt.s32.f32 %v2924_v6  ;;  %v2911_v20 = vcvt.s32.f32 %v2909_v63 }
 0x956   :  { %2928 = vmin.xlane.f32.xlu1 %v2927_v45  ;;  %2913 = vmin.xlane.f32.xlu0 %v2912_v59 }
 0x9de   :  { %v2899_v8 = vpop.xlane.xlu1 %2898 }
 0x9df   :  { %v2884_v15 = vpop.xlane.xlu0 %2883  ;;  %vm2900_vm2 = vcmp.eq.f32.partialorder %v2897_v58, %v2899_v8  ;;  %v2905_v53 = vcvt.f32.s32 %v2899_v8 }
 0x9e0   :  { %v2901_v17 = vsel %vm2900_vm2, %v2896_v13, inf  ;;  %vm2885_vm7 = vcmp.eq.f32.partialorder %v2882_v62, %v2884_v15  ;;  %v2890_v55 = vcvt.f32.s32 %v2884_v15 }
 0x9e1   :  { %2902 = vmin.xlane.f32.xlu1 %v2901_v17  ;;  %v2886_v18 = vsel %vm2885_vm7, %v2881_v11, inf  ;;  %v2906_v35 = vshll.u32 %v2905_v53, 16 }
 0x9e2   :  { %2887 = vmin.xlane.f32.xlu0 %v2886_v18  ;;  %v2891_v29 = vshll.u32 %v2890_v55, 16 }
 0x9e3   :  { %v2929_v19 = vpop.xlane.xlu1 %2928  ;;  %v2914_v23 = vpop.xlane.xlu0 %2913 }
 0x9e4   :  { %vm2930_vm10 = vcmp.eq.f32.partialorder %v2927_v45, %v2929_v19  ;;  %vm2915_vm3 = vcmp.eq.f32.partialorder %v2912_v59, %v2914_v23  ;;  %v2935_v3 = vcvt.f32.s32 %v2929_v19  ;;  %v2920_v30 = vcvt.f32.s32 %v2914_v23 }
 0x9e5   :  { %v2931_v22 = vsel %vm2930_vm10, %v2926_v24, inf  ;;  %v2916_v36 = vsel %vm2915_vm3, %v2911_v20, inf }
 0x9e6   :  { %2932 = vmin.xlane.f32.xlu1 %v2931_v22  ;;  %2917 = vmin.xlane.f32.xlu0 %v2916_v36  ;;  %v2936_v49 = vshll.u32 %v2935_v3, 16  ;;  %v2921_v39 = vshll.u32 %v2920_v30, 16 }
 0xa6e   :  { %v2903_v25 = vpop.xlane.xlu1 %2902 }
 0xa6f   :  { %v2904_v47 = vcvt.f32.s32 %v2903_v25  ;;  %v2888_v26 = vpop.xlane.xlu0 %2887 }
 0xa70   :  { %v2889_v42 = vcvt.f32.s32 %v2888_v26 }
 0xa71   :  { %v2907_v7 = vadd.s32 %v2906_v35, %v2904_v47 }
 0xa72   :  { %v2892_v32 = vadd.s32 %v2891_v29, %v2889_v42 }
 0xa73   :  { %2940 = vst.msk [vmem:[%s4826_s10 + $0x8] sm:$0xff] %vm2938_vm4, %v2907_v7  ;;  %v2933_v33 = vpop.xlane.xlu1 %2932  ;;  %v2918_v34 = vpop.xlane.xlu0 %2917 }
 0xa74   :  { %2939 = vst.msk [vmem:[%s4826_s10] sm:$0xff] %vm2938_vm4, %v2892_v32  ;;  %v2934_v40 = vcvt.f32.s32 %v2933_v33  ;;  %v2919_v41 = vcvt.f32.s32 %v2918_v34 }
 0xa76   :  { %v2937_v43 = vadd.s32 %v2936_v49, %v2934_v40  ;;  %v2922_v14 = vadd.s32 %v2921_v39, %v2919_v41 }
 0xa78   :  { %2942 = vst.msk [vmem:[%s4826_s10 + $0x18] sm:$0xff] %vm2938_vm4, %v2937_v43  ;;  %2941 = vst.msk [vmem:[%s4826_s10 + $0x10] sm:$0xff] %vm2938_vm4, %v2922_v14 }

</bundles_post_ra>
